<compile_context>
chip_gen: v7x
topology: tpu7x:2x2x1
jax: 0.10.0
libtpu: 0.0.40
codegen_flags: <defaults>
</compile_context>

<pallas_src>
import functools

import jax
import jax.numpy as jnp
from jax.experimental import pallas as pl
from jax.experimental.pallas import tpu as pltpu

HIDDEN = 128         # hidden_dim (original module: 1024); multiple of 128
LEAKY_SLOPE = 0.01   # nn.LeakyReLU default
EPS = 1e-6


def _leaky_relu(x):
    return jnp.where(x >= 0, x, LEAKY_SLOPE * x)


def _masked_softmax(logits, mask, eps=EPS):
    # Numerically-stable variant of maskrcnn_benchmark's masked_softmax:
    # exp(x - masked_max) * mask / (sum + eps).  All-zero-mask rows -> zeros.
    neg = jnp.float32(-1e30)
    valid = mask > 0
    safe = jnp.where(valid, logits, neg)
    m = jnp.max(safe, axis=-1, keepdims=True)
    exps = jnp.exp(jnp.where(valid, logits - m, neg)) * mask
    denom = jnp.sum(exps, axis=-1, keepdims=True) + eps
    return exps * pl.reciprocal(denom, approx=True)


def _wpg_kernel(
    word_ref, phr_ref, rel_ref, conn_ref, so_oh_ref, p2r_mask_ref,
    w6_ref, re_w_ref, vecs_ref, a2_b_ref,
    phr_out_ref, rel_out_ref,
    *, r_block,
):
    f32 = jnp.float32
    bf16 = jnp.bfloat16
    P, H = phr_ref.shape
    R = rel_ref.shape[0]

    word = word_ref[...]
    phr = phr_ref[...]
    rel = rel_ref[...]

    # Stacked (H, H) weights (bf16): [w2pw, w2pp(pre-scaled), w2pt, aP, aR, r2p]
    w2pw_w = w6_ref[0]
    w2pp_w = w6_ref[1]
    w2pt_w = w6_ref[2]
    aP_w = w6_ref[3]
    aR_w = w6_ref[4]
    r2p_w = w6_ref[5]

    # Stacked (1, H) vectors (f32):
    # [w2pw_b, w2pp_b(pre-scaled), w2pt_b, re_b, lang_bias, r2p_b, a2_w]
    vecs = vecs_ref[...]
    w2pw_b = vecs[0:1, :]
    w2pp_b = vecs[1:2, :]
    w2pt_b = vecs[2:3, :]
    re_b = vecs[3:4, :]
    lang_b = vecs[4:5, :]
    r2p_b = vecs[5:6, :]
    a2_w = vecs[6:7, :]
    a2_b = a2_b_ref[0]

    word_bf = word.astype(bf16)
    phr_bf = phr.astype(bf16)

    # ---------------- word -> phrase attention ----------------
    w_proj = _leaky_relu(
        jnp.dot(word_bf, w2pw_w, preferred_element_type=f32) + w2pw_b)       # (W, H)
    # w2pp weights/bias are pre-scaled by 1/sqrt(H) on the host (LeakyReLU is
    # positively homogeneous), so no extra scale pass over the logits here.
    p_proj = _leaky_relu(
        jnp.dot(phr_bf, w2pp_w, preferred_element_type=f32) + w2pp_b)        # (P, H)
    att = jax.lax.dot_general(
        p_proj.astype(bf16), w_proj.astype(bf16),
        (((1,), (1,)), ((), ())), preferred_element_type=f32)                # (P, W)
    att = _masked_softmax(att, conn_ref[...].astype(f32))
    agg = jnp.dot(att.astype(bf16), word_bf, preferred_element_type=f32)     # (P, H)
    upd_phr = phr + (jnp.dot(agg.astype(bf16), w2pt_w,
                             preferred_element_type=f32) + w2pt_b)           # (P, H)

    # ---------------- phrase -> relation embedding (fused) ----------------
    # Stacked subj/obj one-hots -> single (2R,P)@(P,H) gather-matmul.
    # TODO(synk): at realistic P,R replace the one-hot matmul with a true row
    # gather (scalar-prefetched subj/obj indices) to avoid O(R*P*H) MXU work.
    upd_phr_bf = upd_phr.astype(bf16)
    so = jnp.dot(so_oh_ref[...], upd_phr_bf, preferred_element_type=f32)     # (2R, H)
    rel_cat = jnp.concatenate([so[:R], so[R:], rel], axis=-1).astype(bf16)   # (R, 3H)
    upd_rel = jnp.dot(rel_cat, re_w_ref[...],
                      preferred_element_type=f32) + re_b                     # (R, H)

    # ---------------- relation -> phrase attention (R-blocked) -------------
    # lang_bias already contains (lang_ctx @ aL_w + a_b1), folded on the host.
    phr_part = (jnp.dot(upd_phr_bf, aP_w, preferred_element_type=f32)
                + lang_b)                                                    # (P, H)
    rel_part = jnp.dot(upd_rel.astype(bf16), aR_w,
                       preferred_element_type=f32)                           # (R, H)

    a2_w3 = a2_w.reshape((1, 1, H))
    score_blocks = []
    for r0 in range(0, R, r_block):          # static, fully unrolled
        r1 = min(r0 + r_block, R)
        rel_blk = rel_part[r0:r1, :]                                         # (tr, H)
        h_blk = _leaky_relu(phr_part[:, None, :] + rel_blk[None, :, :])      # (P,tr,H)
        score_blocks.append(jnp.sum(h_blk * a2_w3, axis=-1) + a2_b)          # (P, tr)
    score = (score_blocks[0] if len(score_blocks) == 1
             else jnp.concatenate(score_blocks, axis=-1))                    # (P, R)

    att2 = _masked_softmax(score, p2r_mask_ref[...].astype(f32))
    agg2 = jnp.dot(att2.astype(bf16), upd_rel.astype(bf16),
                   preferred_element_type=f32)                               # (P, H)
    phr_final = upd_phr + (jnp.dot(agg2.astype(bf16), r2p_w,
                                   preferred_element_type=f32) + r2p_b)

    phr_out_ref[...] = phr_final.astype(phr_out_ref.dtype)
    rel_out_ref[...] = upd_rel.astype(rel_out_ref.dtype)


# ---------------- bidirectional GRU (plain JAX glue) ----------------
# TODO(synk): GRU recurrence is inherently sequential and only feeds the
# (1, 2H) language context; it is computed with lax.scan outside the kernel.
def _gru_bidirectional(x, p):
    Hh = p["w_hh_f"].shape[1]

    def make_step(w_ih, w_hh, b_ih, b_hh):
        def step(h, x_t):
            gi = x_t @ w_ih.T + b_ih
            gh = h @ w_hh.T + b_hh
            i_r, i_z, i_n = jnp.split(gi, 3)
            h_r, h_z, h_n = jnp.split(gh, 3)
            r = jax.nn.sigmoid(i_r + h_r)
            z = jax.nn.sigmoid(i_z + h_z)
            n = jnp.tanh(i_n + r * h_n)
            h_new = (1.0 - z) * n + z * h
            return h_new, h_new
        return step

    h0 = jnp.zeros((Hh,), jnp.float32)
    _, fwd = jax.lax.scan(
        make_step(p["w_ih_f"], p["w_hh_f"], p["b_ih_f"], p["b_hh_f"]), h0, x)
    _, bwd = jax.lax.scan(
        make_step(p["w_ih_b"], p["w_hh_b"], p["b_ih_b"], p["b_hh_b"]), h0, x[::-1])
    bwd = bwd[::-1]
    return jnp.concatenate([fwd, bwd], axis=-1)  # (T, H)


def word_phrase_graph_forward(params, word_feat, phrase_feat, rel_feat,
                              rel_conn_mat, word_to_graph_conn, r_block=128):
    f32, bf16 = jnp.float32, jnp.bfloat16
    P, H = phrase_feat.shape
    R = rel_conn_mat.shape[1]

    # language context (sequential GRU, plain JAX)
    lang_feat = _gru_bidirectional(word_feat, params["gru"])                 # (W, H)
    lang_ctx = jnp.concatenate([lang_feat[0], lang_feat[-1]])[None, :]       # (1, 2H)
    # Fold the language-context projection of the attention MLP into one bias.
    lang_bias = lang_ctx @ params["aL_w"] + params["a_b1"]                   # (1, H)

    # index preprocessing (plain JAX)
    subj = rel_conn_mat[0]
    obj = rel_conn_mat[1]
    p_ids = jnp.arange(P)
    subj_oh = subj[:, None] == p_ids[None, :]                                # (R, P)
    obj_oh = obj[:, None] == p_ids[None, :]                                  # (R, P)
    so_oh = jnp.concatenate([subj_oh, obj_oh], axis=0).astype(bf16)          # (2R, P)
    p2r_mask = (subj_oh | obj_oh).T.astype(bf16)                             # (P, R)
    conn = word_to_graph_conn.astype(bf16)                                   # (P, W)

    # Fold the 1/sqrt(H) attention scale into the word2phr_p linear.
    scale = 1.0 / (H ** 0.5)
    w2pp_w_s = params["w2pp_w"] * scale
    w2pp_b_s = params["w2pp_b"] * scale

    weights6 = jnp.stack(
        [params["w2pw_w"], w2pp_w_s, params["w2pt_w"],
         params["aP_w"], params["aR_w"], params["r2p_w"]], axis=0).astype(bf16)
    re_w = params["re_w"].astype(bf16)                                       # (3H, H)
    vecs = jnp.concatenate(
        [params["w2pw_b"], w2pp_b_s, params["w2pt_b"], params["re_b"],
         lang_bias, params["r2p_b"], params["a2_w"]], axis=0).astype(f32)    # (7, H)
    a2_b = params["a2_b"].reshape((1,)).astype(f32)

    vmem = pl.BlockSpec(memory_space=pltpu.MemorySpace.VMEM)
    smem = pl.BlockSpec(memory_space=pltpu.MemorySpace.SMEM)

    # TODO(synk): for v7x megacore / multi-graph batches, add a "parallel"
    # grid axis over graphs (or P-blocks of the rel->phrase stage) so work is
    # sharded across both TensorCores; a single graph runs grid-less here.
    upd_phr, upd_rel = pl.pallas_call(
        functools.partial(_wpg_kernel, r_block=r_block),
        out_shape=(jax.ShapeDtypeStruct((P, H), f32),
                   jax.ShapeDtypeStruct((R, H), f32)),
        in_specs=[vmem] * 9 + [smem],
        out_specs=(vmem, vmem),
        compiler_params=pltpu.CompilerParams(vmem_limit_bytes=64 * 1024 * 1024),
    )(word_feat, phrase_feat, rel_feat, conn, so_oh, p2r_mask,
      weights6, re_w, vecs, a2_b)
    return word_feat, upd_phr, upd_rel


def init_params(key, H=HIDDEN):
    Hh = H // 2
    keys = jax.random.split(key, 24)
    ki = iter(keys)

    def u(shape, scale=0.1):
        return jax.random.uniform(next(ki), shape, jnp.float32, -scale, scale)

    params = {
        # Linear weights stored pre-transposed (in, out): kernel does x @ Wt + b.
        "w2pw_w": u((H, H)), "w2pw_b": u((1, H)),
        "w2pp_w": u((H, H)), "w2pp_b": u((1, H)),
        "w2pt_w": u((H, H)), "w2pt_b": u((1, H)),
        "re_w": u((3 * H, H)), "re_b": u((1, H)),      # rel_embed: Linear(3H, H)
        "a_b1": u((1, H)),                             # rel2phr_atten Linear(4H,H) bias
        "a2_w": u((1, H)), "a2_b": u((1, 1)),          # rel2phr_atten Linear(H, 1)
        "r2p_w": u((H, H)), "r2p_b": u((1, H)),
    }
    a1_wt = u((4 * H, H))                              # rel2phr_atten Linear(4H, H)
    params["aP_w"] = a1_wt[:H]
    params["aR_w"] = a1_wt[H:2 * H]
    params["aL_w"] = a1_wt[2 * H:]                     # (2H, H) language-context part
    params["gru"] = {
        "w_ih_f": u((3 * Hh, H)), "w_hh_f": u((3 * Hh, Hh)),
        "b_ih_f": u((3 * Hh,)), "b_hh_f": u((3 * Hh,)),
        "w_ih_b": u((3 * Hh, H)), "w_hh_b": u((3 * Hh, Hh)),
        "b_ih_b": u((3 * Hh,)), "b_hh_b": u((3 * Hh,)),
    }
    return params


if __name__ == "__main__":
    key = jax.random.PRNGKey(0)
    kp, kw, kph, kr, kc, km = jax.random.split(key, 6)
    H = HIDDEN
    W_words, P, R = 16, 16, 32

    params = init_params(kp, H)
    word_feat = jax.random.normal(kw, (W_words, H), jnp.float32)
    phrase_feat = jax.random.normal(kph, (P, H), jnp.float32)
    rel_feat = jax.random.normal(kr, (R, H), jnp.float32)
    rel_conn_mat = jax.random.randint(kc, (2, R), 0, P)
    word_to_graph_conn = jax.random.bernoulli(km, 0.5, (P, W_words)).astype(jnp.int32)

    fwd = jax.jit(functools.partial(word_phrase_graph_forward, r_block=16))
    out = fwd(params, word_feat, phrase_feat, rel_feat, rel_conn_mat,
              word_to_graph_conn)
    jax.block_until_ready(out)

    w_out, phr_out, rel_out = out
    assert w_out.shape == (W_words, H)
    assert phr_out.shape == (P, H)
    assert rel_out.shape == (R, H)
    assert bool(jnp.all(jnp.isfinite(phr_out)))
    assert bool(jnp.all(jnp.isfinite(rel_out)))
    print("KERNEL_OK")
</pallas_src>

<mosaic_0001>
module attributes {stable_mosaic.version = 11 : i64} {
  func.func @_wpg_kernel(%arg0: memref<16x128xf32, #tpu.memory_space<vmem>>, %arg1: memref<16x128xf32, #tpu.memory_space<vmem>>, %arg2: memref<32x128xf32, #tpu.memory_space<vmem>>, %arg3: memref<16x16xbf16, #tpu.memory_space<vmem>>, %arg4: memref<64x16xbf16, #tpu.memory_space<vmem>>, %arg5: memref<16x32xbf16, #tpu.memory_space<vmem>>, %arg6: memref<6x128x128xbf16, #tpu.memory_space<vmem>>, %arg7: memref<384x128xbf16, #tpu.memory_space<vmem>>, %arg8: memref<7x128xf32, #tpu.memory_space<vmem>>, %arg9: memref<1xf32, #tpu.memory_space<smem>>, %arg10: memref<16x128xf32, #tpu.memory_space<vmem>>, %arg11: memref<32x128xf32, #tpu.memory_space<vmem>>) attributes {dimension_semantics = [], scalar_prefetch = 0 : i64, scratch_operands = 0 : i64, tpu.core_type = #tpu.core_type<tc>} {
    %c0 = arith.constant 0 : index
    %c0_0 = arith.constant 0 : index
    %0 = vector.load %arg0[%c0, %c0_0] : memref<16x128xf32, #tpu.memory_space<vmem>>, vector<16x128xf32>
    %c0_1 = arith.constant 0 : index
    %c0_2 = arith.constant 0 : index
    %1 = vector.load %arg1[%c0_1, %c0_2] : memref<16x128xf32, #tpu.memory_space<vmem>>, vector<16x128xf32>
    %c0_3 = arith.constant 0 : index
    %c0_4 = arith.constant 0 : index
    %2 = vector.load %arg2[%c0_3, %c0_4] : memref<32x128xf32, #tpu.memory_space<vmem>>, vector<32x128xf32>
    %c0_5 = arith.constant 0 : index
    %c0_6 = arith.constant 0 : index
    %c0_7 = arith.constant 0 : index
    %3 = vector.load %arg6[%c0_5, %c0_6, %c0_7] : memref<6x128x128xbf16, #tpu.memory_space<vmem>>, vector<1x128x128xbf16>
    %4 = vector.shape_cast %3 : vector<1x128x128xbf16> to vector<128x128xbf16>
    %c1 = arith.constant 1 : index
    %c0_8 = arith.constant 0 : index
    %c0_9 = arith.constant 0 : index
    %5 = vector.load %arg6[%c1, %c0_8, %c0_9] : memref<6x128x128xbf16, #tpu.memory_space<vmem>>, vector<1x128x128xbf16>
    %6 = vector.shape_cast %5 : vector<1x128x128xbf16> to vector<128x128xbf16>
    %c2 = arith.constant 2 : index
    %c0_10 = arith.constant 0 : index
    %c0_11 = arith.constant 0 : index
    %7 = vector.load %arg6[%c2, %c0_10, %c0_11] : memref<6x128x128xbf16, #tpu.memory_space<vmem>>, vector<1x128x128xbf16>
    %8 = vector.shape_cast %7 : vector<1x128x128xbf16> to vector<128x128xbf16>
    %c3 = arith.constant 3 : index
    %c0_12 = arith.constant 0 : index
    %c0_13 = arith.constant 0 : index
    %9 = vector.load %arg6[%c3, %c0_12, %c0_13] : memref<6x128x128xbf16, #tpu.memory_space<vmem>>, vector<1x128x128xbf16>
    %10 = vector.shape_cast %9 : vector<1x128x128xbf16> to vector<128x128xbf16>
    %c4 = arith.constant 4 : index
    %c0_14 = arith.constant 0 : index
    %c0_15 = arith.constant 0 : index
    %11 = vector.load %arg6[%c4, %c0_14, %c0_15] : memref<6x128x128xbf16, #tpu.memory_space<vmem>>, vector<1x128x128xbf16>
    %12 = vector.shape_cast %11 : vector<1x128x128xbf16> to vector<128x128xbf16>
    %c5 = arith.constant 5 : index
    %c0_16 = arith.constant 0 : index
    %c0_17 = arith.constant 0 : index
    %13 = vector.load %arg6[%c5, %c0_16, %c0_17] : memref<6x128x128xbf16, #tpu.memory_space<vmem>>, vector<1x128x128xbf16>
    %14 = vector.shape_cast %13 : vector<1x128x128xbf16> to vector<128x128xbf16>
    %c0_18 = arith.constant 0 : index
    %c0_19 = arith.constant 0 : index
    %15 = vector.load %arg8[%c0_18, %c0_19] : memref<7x128xf32, #tpu.memory_space<vmem>>, vector<7x128xf32>
    %16 = vector.extract_strided_slice %15 {offsets = [0, 0], sizes = [1, 128], strides = [1, 1]} : vector<7x128xf32> to vector<1x128xf32>
    %17 = vector.extract_strided_slice %15 {offsets = [1, 0], sizes = [1, 128], strides = [1, 1]} : vector<7x128xf32> to vector<1x128xf32>
    %18 = vector.extract_strided_slice %15 {offsets = [2, 0], sizes = [1, 128], strides = [1, 1]} : vector<7x128xf32> to vector<1x128xf32>
    %19 = vector.extract_strided_slice %15 {offsets = [3, 0], sizes = [1, 128], strides = [1, 1]} : vector<7x128xf32> to vector<1x128xf32>
    %20 = vector.extract_strided_slice %15 {offsets = [4, 0], sizes = [1, 128], strides = [1, 1]} : vector<7x128xf32> to vector<1x128xf32>
    %21 = vector.extract_strided_slice %15 {offsets = [5, 0], sizes = [1, 128], strides = [1, 1]} : vector<7x128xf32> to vector<1x128xf32>
    %22 = vector.extract_strided_slice %15 {offsets = [6, 0], sizes = [1, 128], strides = [1, 1]} : vector<7x128xf32> to vector<1x128xf32>
    %c0_20 = arith.constant 0 : index
    %23 = memref.load %arg9[%c0_20] : memref<1xf32, #tpu.memory_space<smem>>
    %24 = arith.truncf %0 : vector<16x128xf32> to vector<16x128xbf16>
    %25 = arith.truncf %1 : vector<16x128xf32> to vector<16x128xbf16>
    %cst = arith.constant dense<0.000000e+00> : vector<16x128xf32>
    %26 = tpu.matmul %24, %4, %cst {dimension_numbers = #tpu.dot_dimension_numbers<[1], [0], [0], [1], [0, 0, 1, 1], [], []>} : vector<16x128xbf16>, vector<128x128xbf16>, vector<16x128xf32> -> vector<16x128xf32>
    %27 = vector.broadcast %16 : vector<1x128xf32> to vector<16x128xf32>
    %28 = arith.addf %26, %27 : vector<16x128xf32>
    %cst_21 = arith.constant 0.000000e+00 : f32
    %29 = vector.broadcast %cst_21 : f32 to vector<16x128xf32>
    %30 = arith.cmpf oge, %28, %29 : vector<16x128xf32>
    %cst_22 = arith.constant 0.00999999977 : f32
    %31 = vector.broadcast %cst_22 : f32 to vector<16x128xf32>
    %32 = arith.mulf %31, %28 : vector<16x128xf32>
    %33 = arith.select %30, %28, %32 : vector<16x128xi1>, vector<16x128xf32>
    %cst_23 = arith.constant dense<0.000000e+00> : vector<16x128xf32>
    %34 = tpu.matmul %25, %6, %cst_23 {dimension_numbers = #tpu.dot_dimension_numbers<[1], [0], [0], [1], [0, 0, 1, 1], [], []>} : vector<16x128xbf16>, vector<128x128xbf16>, vector<16x128xf32> -> vector<16x128xf32>
    %35 = vector.broadcast %17 : vector<1x128xf32> to vector<16x128xf32>
    %36 = arith.addf %34, %35 : vector<16x128xf32>
    %cst_24 = arith.constant 0.000000e+00 : f32
    %37 = vector.broadcast %cst_24 : f32 to vector<16x128xf32>
    %38 = arith.cmpf oge, %36, %37 : vector<16x128xf32>
    %cst_25 = arith.constant 0.00999999977 : f32
    %39 = vector.broadcast %cst_25 : f32 to vector<16x128xf32>
    %40 = arith.mulf %39, %36 : vector<16x128xf32>
    %41 = arith.select %38, %36, %40 : vector<16x128xi1>, vector<16x128xf32>
    %42 = arith.truncf %41 : vector<16x128xf32> to vector<16x128xbf16>
    %43 = arith.truncf %33 : vector<16x128xf32> to vector<16x128xbf16>
    %cst_26 = arith.constant dense<0.000000e+00> : vector<16x16xf32>
    %44 = tpu.matmul %42, %43, %cst_26 {dimension_numbers = #tpu.dot_dimension_numbers<[1], [1], [0], [0], [0, 0, 1, 0], [], []>} : vector<16x128xbf16>, vector<16x128xbf16>, vector<16x16xf32> -> vector<16x16xf32>
    %c0_27 = arith.constant 0 : index
    %c0_28 = arith.constant 0 : index
    %45 = vector.load %arg3[%c0_27, %c0_28] : memref<16x16xbf16, #tpu.memory_space<vmem>>, vector<16x16xbf16>
    %46 = arith.extf %45 : vector<16x16xbf16> to vector<16x16xf32>
    %cst_29 = arith.constant 0.000000e+00 : f32
    %47 = vector.broadcast %cst_29 : f32 to vector<16x16xf32>
    %48 = arith.cmpf ogt, %46, %47 : vector<16x16xf32>
    %cst_30 = arith.constant -1.000000e+30 : f32
    %49 = vector.broadcast %cst_30 : f32 to vector<16x16xf32>
    %50 = arith.select %48, %44, %49 : vector<16x16xi1>, vector<16x16xf32>
    %cst_31 = arith.constant dense<0xFF800000> : vector<16xf32>
    %51 = vector.multi_reduction <maximumf>, %50, %cst_31 [1] : vector<16x16xf32> to vector<16xf32>
    %52 = vector.shape_cast %51 : vector<16xf32> to vector<16x1xf32>
    %53 = vector.broadcast %52 : vector<16x1xf32> to vector<16x16xf32>
    %54 = arith.subf %44, %53 : vector<16x16xf32>
    %cst_32 = arith.constant -1.000000e+30 : f32
    %55 = vector.broadcast %cst_32 : f32 to vector<16x16xf32>
    %56 = arith.select %48, %54, %55 : vector<16x16xi1>, vector<16x16xf32>
    %57 = math.exp %56 : vector<16x16xf32>
    %58 = arith.mulf %57, %46 : vector<16x16xf32>
    %cst_33 = arith.constant dense<0.000000e+00> : vector<16xf32>
    %59 = vector.multi_reduction <add>, %58, %cst_33 [1] : vector<16x16xf32> to vector<16xf32>
    %60 = vector.shape_cast %59 : vector<16xf32> to vector<16x1xf32>
    %cst_34 = arith.constant 9.99999997E-7 : f32
    %61 = vector.broadcast %cst_34 : f32 to vector<16x1xf32>
    %62 = arith.addf %60, %61 : vector<16x1xf32>
    %63 = tpu.reciprocal %62 {approx = true} : vector<16x1xf32> -> vector<16x1xf32>
    %64 = vector.broadcast %63 : vector<16x1xf32> to vector<16x16xf32>
    %65 = arith.mulf %58, %64 : vector<16x16xf32>
    %66 = arith.truncf %65 : vector<16x16xf32> to vector<16x16xbf16>
    %cst_35 = arith.constant dense<0.000000e+00> : vector<16x128xf32>
    %67 = tpu.matmul %66, %24, %cst_35 {dimension_numbers = #tpu.dot_dimension_numbers<[1], [0], [0], [1], [0, 0, 1, 1], [], []>} : vector<16x16xbf16>, vector<16x128xbf16>, vector<16x128xf32> -> vector<16x128xf32>
    %68 = arith.truncf %67 : vector<16x128xf32> to vector<16x128xbf16>
    %cst_36 = arith.constant dense<0.000000e+00> : vector<16x128xf32>
    %69 = tpu.matmul %68, %8, %cst_36 {dimension_numbers = #tpu.dot_dimension_numbers<[1], [0], [0], [1], [0, 0, 1, 1], [], []>} : vector<16x128xbf16>, vector<128x128xbf16>, vector<16x128xf32> -> vector<16x128xf32>
    %70 = vector.broadcast %18 : vector<1x128xf32> to vector<16x128xf32>
    %71 = arith.addf %69, %70 : vector<16x128xf32>
    %72 = arith.addf %1, %71 : vector<16x128xf32>
    %73 = arith.truncf %72 : vector<16x128xf32> to vector<16x128xbf16>
    %c0_37 = arith.constant 0 : index
    %c0_38 = arith.constant 0 : index
    %74 = vector.load %arg4[%c0_37, %c0_38] : memref<64x16xbf16, #tpu.memory_space<vmem>>, vector<64x16xbf16>
    %cst_39 = arith.constant dense<0.000000e+00> : vector<64x128xf32>
    %75 = tpu.matmul %74, %73, %cst_39 {dimension_numbers = #tpu.dot_dimension_numbers<[1], [0], [0], [1], [0, 0, 1, 1], [], []>} : vector<64x16xbf16>, vector<16x128xbf16>, vector<64x128xf32> -> vector<64x128xf32>
    %76 = vector.extract_strided_slice %75 {offsets = [0, 0], sizes = [32, 128], strides = [1, 1]} : vector<64x128xf32> to vector<32x128xf32>
    %77 = vector.extract_strided_slice %75 {offsets = [32, 0], sizes = [32, 128], strides = [1, 1]} : vector<64x128xf32> to vector<32x128xf32>
    %78 = tpu.concatenate %76, %77, %2 in 1 : vector<32x128xf32>, vector<32x128xf32>, vector<32x128xf32> -> vector<32x384xf32>
    %79 = arith.truncf %78 : vector<32x384xf32> to vector<32x384xbf16>
    %c0_40 = arith.constant 0 : index
    %c0_41 = arith.constant 0 : index
    %80 = vector.load %arg7[%c0_40, %c0_41] : memref<384x128xbf16, #tpu.memory_space<vmem>>, vector<384x128xbf16>
    %cst_42 = arith.constant dense<0.000000e+00> : vector<32x128xf32>
    %81 = tpu.matmul %79, %80, %cst_42 {dimension_numbers = #tpu.dot_dimension_numbers<[1], [0], [0], [1], [0, 0, 1, 1], [], []>} : vector<32x384xbf16>, vector<384x128xbf16>, vector<32x128xf32> -> vector<32x128xf32>
    %82 = vector.broadcast %19 : vector<1x128xf32> to vector<32x128xf32>
    %83 = arith.addf %81, %82 : vector<32x128xf32>
    %cst_43 = arith.constant dense<0.000000e+00> : vector<16x128xf32>
    %84 = tpu.matmul %73, %10, %cst_43 {dimension_numbers = #tpu.dot_dimension_numbers<[1], [0], [0], [1], [0, 0, 1, 1], [], []>} : vector<16x128xbf16>, vector<128x128xbf16>, vector<16x128xf32> -> vector<16x128xf32>
    %85 = vector.broadcast %20 : vector<1x128xf32> to vector<16x128xf32>
    %86 = arith.addf %84, %85 : vector<16x128xf32>
    %87 = arith.truncf %83 : vector<32x128xf32> to vector<32x128xbf16>
    %cst_44 = arith.constant dense<0.000000e+00> : vector<32x128xf32>
    %88 = tpu.matmul %87, %12, %cst_44 {dimension_numbers = #tpu.dot_dimension_numbers<[1], [0], [0], [1], [0, 0, 1, 1], [], []>} : vector<32x128xbf16>, vector<128x128xbf16>, vector<32x128xf32> -> vector<32x128xf32>
    %89 = vector.shape_cast %22 : vector<1x128xf32> to vector<1x1x128xf32>
    %90 = vector.extract_strided_slice %88 {offsets = [0, 0], sizes = [16, 128], strides = [1, 1]} : vector<32x128xf32> to vector<16x128xf32>
    %91 = vector.shape_cast %86 : vector<16x128xf32> to vector<16x1x128xf32>
    %92 = vector.shape_cast %90 : vector<16x128xf32> to vector<1x16x128xf32>
    %93 = vector.broadcast %91 : vector<16x1x128xf32> to vector<16x16x128xf32>
    %94 = vector.broadcast %92 : vector<1x16x128xf32> to vector<16x16x128xf32>
    %95 = arith.addf %93, %94 : vector<16x16x128xf32>
    %cst_45 = arith.constant 0.000000e+00 : f32
    %96 = vector.broadcast %cst_45 : f32 to vector<16x16x128xf32>
    %97 = arith.cmpf oge, %95, %96 : vector<16x16x128xf32>
    %cst_46 = arith.constant 0.00999999977 : f32
    %98 = vector.broadcast %cst_46 : f32 to vector<16x16x128xf32>
    %99 = arith.mulf %98, %95 : vector<16x16x128xf32>
    %100 = arith.select %97, %95, %99 : vector<16x16x128xi1>, vector<16x16x128xf32>
    %101 = vector.broadcast %89 : vector<1x1x128xf32> to vector<16x16x128xf32>
    %102 = arith.mulf %100, %101 : vector<16x16x128xf32>
    %cst_47 = arith.constant dense<0.000000e+00> : vector<16x16xf32>
    %103 = vector.multi_reduction <add>, %102, %cst_47 [2] : vector<16x16x128xf32> to vector<16x16xf32>
    %104 = vector.broadcast %23 : f32 to vector<16x16xf32>
    %105 = arith.addf %103, %104 : vector<16x16xf32>
    %106 = vector.extract_strided_slice %88 {offsets = [16, 0], sizes = [16, 128], strides = [1, 1]} : vector<32x128xf32> to vector<16x128xf32>
    %107 = vector.shape_cast %86 : vector<16x128xf32> to vector<16x1x128xf32>
    %108 = vector.shape_cast %106 : vector<16x128xf32> to vector<1x16x128xf32>
    %109 = vector.broadcast %107 : vector<16x1x128xf32> to vector<16x16x128xf32>
    %110 = vector.broadcast %108 : vector<1x16x128xf32> to vector<16x16x128xf32>
    %111 = arith.addf %109, %110 : vector<16x16x128xf32>
    %cst_48 = arith.constant 0.000000e+00 : f32
    %112 = vector.broadcast %cst_48 : f32 to vector<16x16x128xf32>
    %113 = arith.cmpf oge, %111, %112 : vector<16x16x128xf32>
    %cst_49 = arith.constant 0.00999999977 : f32
    %114 = vector.broadcast %cst_49 : f32 to vector<16x16x128xf32>
    %115 = arith.mulf %114, %111 : vector<16x16x128xf32>
    %116 = arith.select %113, %111, %115 : vector<16x16x128xi1>, vector<16x16x128xf32>
    %117 = vector.broadcast %89 : vector<1x1x128xf32> to vector<16x16x128xf32>
    %118 = arith.mulf %116, %117 : vector<16x16x128xf32>
    %cst_50 = arith.constant dense<0.000000e+00> : vector<16x16xf32>
    %119 = vector.multi_reduction <add>, %118, %cst_50 [2] : vector<16x16x128xf32> to vector<16x16xf32>
    %120 = vector.broadcast %23 : f32 to vector<16x16xf32>
    %121 = arith.addf %119, %120 : vector<16x16xf32>
    %122 = tpu.concatenate %105, %121 in 1 : vector<16x16xf32>, vector<16x16xf32> -> vector<16x32xf32>
    %c0_51 = arith.constant 0 : index
    %c0_52 = arith.constant 0 : index
    %123 = vector.load %arg5[%c0_51, %c0_52] : memref<16x32xbf16, #tpu.memory_space<vmem>>, vector<16x32xbf16>
    %124 = arith.extf %123 : vector<16x32xbf16> to vector<16x32xf32>
    %cst_53 = arith.constant 0.000000e+00 : f32
    %125 = vector.broadcast %cst_53 : f32 to vector<16x32xf32>
    %126 = arith.cmpf ogt, %124, %125 : vector<16x32xf32>
    %cst_54 = arith.constant -1.000000e+30 : f32
    %127 = vector.broadcast %cst_54 : f32 to vector<16x32xf32>
    %128 = arith.select %126, %122, %127 : vector<16x32xi1>, vector<16x32xf32>
    %cst_55 = arith.constant dense<0xFF800000> : vector<16xf32>
    %129 = vector.multi_reduction <maximumf>, %128, %cst_55 [1] : vector<16x32xf32> to vector<16xf32>
    %130 = vector.shape_cast %129 : vector<16xf32> to vector<16x1xf32>
    %131 = vector.broadcast %130 : vector<16x1xf32> to vector<16x32xf32>
    %132 = arith.subf %122, %131 : vector<16x32xf32>
    %cst_56 = arith.constant -1.000000e+30 : f32
    %133 = vector.broadcast %cst_56 : f32 to vector<16x32xf32>
    %134 = arith.select %126, %132, %133 : vector<16x32xi1>, vector<16x32xf32>
    %135 = math.exp %134 : vector<16x32xf32>
    %136 = arith.mulf %135, %124 : vector<16x32xf32>
    %cst_57 = arith.constant dense<0.000000e+00> : vector<16xf32>
    %137 = vector.multi_reduction <add>, %136, %cst_57 [1] : vector<16x32xf32> to vector<16xf32>
    %138 = vector.shape_cast %137 : vector<16xf32> to vector<16x1xf32>
    %cst_58 = arith.constant 9.99999997E-7 : f32
    %139 = vector.broadcast %cst_58 : f32 to vector<16x1xf32>
    %140 = arith.addf %138, %139 : vector<16x1xf32>
    %141 = tpu.reciprocal %140 {approx = true} : vector<16x1xf32> -> vector<16x1xf32>
    %142 = vector.broadcast %141 : vector<16x1xf32> to vector<16x32xf32>
    %143 = arith.mulf %136, %142 : vector<16x32xf32>
    %144 = arith.truncf %143 : vector<16x32xf32> to vector<16x32xbf16>
    %145 = arith.truncf %83 : vector<32x128xf32> to vector<32x128xbf16>
    %cst_59 = arith.constant dense<0.000000e+00> : vector<16x128xf32>
    %146 = tpu.matmul %144, %145, %cst_59 {dimension_numbers = #tpu.dot_dimension_numbers<[1], [0], [0], [1], [0, 0, 1, 1], [], []>} : vector<16x32xbf16>, vector<32x128xbf16>, vector<16x128xf32> -> vector<16x128xf32>
    %147 = arith.truncf %146 : vector<16x128xf32> to vector<16x128xbf16>
    %cst_60 = arith.constant dense<0.000000e+00> : vector<16x128xf32>
    %148 = tpu.matmul %147, %14, %cst_60 {dimension_numbers = #tpu.dot_dimension_numbers<[1], [0], [0], [1], [0, 0, 1, 1], [], []>} : vector<16x128xbf16>, vector<128x128xbf16>, vector<16x128xf32> -> vector<16x128xf32>
    %149 = vector.broadcast %21 : vector<1x128xf32> to vector<16x128xf32>
    %150 = arith.addf %148, %149 : vector<16x128xf32>
    %151 = arith.addf %72, %150 : vector<16x128xf32>
    %c0_61 = arith.constant 0 : index
    %c0_62 = arith.constant 0 : index
    %152 = vector.load %arg10[%c0_61, %c0_62] : memref<16x128xf32, #tpu.memory_space<vmem>>, vector<16x128xf32>
    tpu.vector_store %arg10[%c0_61, %c0_62], %151 {strides = array<i32>} : memref<16x128xf32, #tpu.memory_space<vmem>>, vector<16x128xf32>,
    %c0_63 = arith.constant 0 : index
    %c0_64 = arith.constant 0 : index
    %153 = vector.load %arg11[%c0_63, %c0_64] : memref<32x128xf32, #tpu.memory_space<vmem>>, vector<32x128xf32>
    tpu.vector_store %arg11[%c0_63, %c0_64], %83 {strides = array<i32>} : memref<32x128xf32, #tpu.memory_space<vmem>>, vector<32x128xf32>,
    return
  }
}

</mosaic_0001>

<bundles_post_ra>
// kernel: custom-call.1
= control target key start
LH: loop header
LB: loop body
LE: loop exit
PB: predicated region body
PF: predicated region fallthrough
CT: control target
= control target key end

     0   :  { %s6_s0 = inlined_call_operand.vmem [shape: f32[64], index: 0, kind: output, shape index: {}]  }

// kernel: word_phrase_graph_forward.1
= control target key start
LH: loop header
LB: loop body
LE: loop exit
PB: predicated region body
PF: predicated region fallthrough
CT: control target
= control target key end

     0   :  { %18 = vsyncpa [#allocation4], 0  ;;  %s4509_s0 = inlined_call_operand.hbm [shape: f32[16,128], index: 0, kind: input, shape index: {}]   ;;  %s4510_s1 = inlined_call_operand.hbm [shape: f32[16,128], index: 1, kind: input, shape index: {}]   ;;  %s4511_s2 = inlined_call_operand.hbm [shape: f32[32,128], index: 2, kind: input, shape index: {}]   ;;  %s4512_s3 = inlined_call_operand.hbm [shape: bf16[16,16], index: 3, kind: input, shape index: {}]   ;;  %s4513_s4 = inlined_call_operand.hbm [shape: bf16[64,16], index: 4, kind: input, shape index: {}]   ;;  %s4514_s5 = inlined_call_operand.hbm [shape: bf16[16,32], index: 5, kind: input, shape index: {}]   ;;  %s4515_s6 = inlined_call_operand.hbm [shape: bf16[6,128,128], index: 6, kind: input, shape index: {}]   ;;  %s4516_s7 = inlined_call_operand.hbm [shape: bf16[384,128], index: 7, kind: input, shape index: {}]   ;;  %s4517_s8 = inlined_call_operand.hbm [shape: f32[7,128], index: 8, kind: input, shape index: {}]   ;;  %s4518_s9 = inlined_call_operand.<no memory space> [shape: f32[1], index: 9, kind: input, shape index: {}]   ;;  %s4519_s10 = inlined_call_operand.hbm [shape: f32[16,128], index: 10, kind: output, shape index: {0}]   ;;  %s4520_s11 = inlined_call_operand.hbm [shape: f32[32,128], index: 11, kind: output, shape index: {1}]  }
   0x1   :  { %19 = vsyncpa [#allocation7], 0 }
   0x2   :  { %20 = vsyncpa [#allocation10], 0 }
   0x3   :  { %21 = vsyncpa [#allocation13], 0 }
   0x4   :  { %22 = vsyncpa [#allocation16], 0 }
   0x5   :  { %23 = vsyncpa [#allocation5], 0 }
   0x6   :  { %24 = vsyncpa [#allocation20], 0  ;;  %s3341_s17 = smov [#allocation6]   ;;  %s3342_s19 = smov [#allocation9]  }
   0x7   :  { %s42_s18 = sshll.u32 %s3341_s17, 4  ;;  %s66_s20 = sshll.u32 %s3342_s19, 4  ;;  %s43_s18 = int_to_ptr.vmem [resolvable:$true] %s42_s18  ;;  %s3419_s20 = int_to_ptr.vmem [resolvable:$true] %s66_s20 }
   0x8   :  { %s3085_s23 = scalar_lea.hbm %s4510_s1, 256 }
   0x9   :  { %p3086_p0 = scmp.ne.s32.totalorder %s4510_s1, %s3085_s23  ;;  %p3089_p1 = scmp.lt.u32.totalorder %s3085_s23, %s4510_s1 }
   0xb   :  { %p3091_p2 = pnand %p3089_p1, %p3086_p0 }
   0xd   :  { %3094 = shalt.err (!%p3091_p2)
}
   0xe   :  { %s3095_s28 = scalar_lea.vmem %s43_s18, 256  ;;  %p3100_p4 = scmp.lt.s32.totalorder %s43_s18, %s43_s18 }
   0xf   :  { %p3096_p3 = scmp.ne.s32.totalorder %s43_s18, %s3095_s28  ;;  %p3101_p5 = scmp.lt.s32.totalorder %s3095_s28, %s3095_s28 }
  0x11   :  { %p3102_p6 = por %p3101_p5, %p3100_p4 }
  0x13   :  { %p3103_p7 = pnand %p3102_p6, %p3096_p3 }
  0x15   :  { %3106 = shalt.err (!%p3103_p7)
}
  0x16   :  { %s3343_s29 = smov 128   ;;  %s3344_s30 = smov 8  }
  0x17   :  { %48 = dma.hbm_to_vmem [thread:$0]  %s4510_s1, 256, %s43_s18, [#allocation7], %s3343_s29, %s3343_s29, %s3344_s30  }
  0x18   :  { %s3107_s16 = scalar_lea.hbm %s4512_s3, 128 }
  0x19   :  { %p3108_p8 = scmp.ne.s32.totalorder %s4512_s3, %s3107_s16  ;;  %p3111_p9 = scmp.lt.u32.totalorder %s3107_s16, %s4512_s3 }
  0x1b   :  { %p3113_p10 = pnand %p3111_p9, %p3108_p8 }
  0x1d   :  { %3116 = shalt.err (!%p3113_p10)
}
  0x1e   :  { %s3117_s23 = scalar_lea.vmem %s3419_s20, 128  ;;  %p3122_p12 = scmp.lt.s32.totalorder %s3419_s20, %s3419_s20 }
  0x1f   :  { %p3118_p11 = scmp.ne.s32.totalorder %s3419_s20, %s3117_s23  ;;  %p3123_p13 = scmp.lt.s32.totalorder %s3117_s23, %s3117_s23 }
  0x21   :  { %p3124_p0 = por %p3123_p13, %p3122_p12 }
  0x23   :  { %p3125_p1 = pnand %p3124_p0, %p3118_p11 }
  0x25   :  { %3128 = shalt.err (!%p3125_p1)
}
  0x26   :  { %s3345_s1 = smov 64   ;;  %s3346_s18 = smov 4  }
  0x27   :  { %72 = dma.hbm_to_vmem [thread:$0]  %s4512_s3, 128, %s3419_s20, [#allocation10], %s3345_s1, %s3345_s1, %s3346_s18  }
  0x28   :  { %s3347_s26 = smov [#allocation12]   ;;  %s3348_s28 = smov [#allocation15]  }
  0x29   :  { %s90_s27 = sshll.u32 %s3347_s26, 4  ;;  %s114_s12 = sshll.u32 %s3348_s28, 4  ;;  %s91_s27 = int_to_ptr.vmem [resolvable:$true] %s90_s27  ;;  %s3456_s12 = int_to_ptr.vmem [resolvable:$true] %s114_s12 }
  0x2a   :  { %s3129_s15 = scalar_lea.hbm %s4514_s5, 128 }
  0x2b   :  { %p3130_p2 = scmp.ne.s32.totalorder %s4514_s5, %s3129_s15  ;;  %p3133_p3 = scmp.lt.u32.totalorder %s3129_s15, %s4514_s5 }
  0x2d   :  { %p3135_p4 = pnand %p3133_p3, %p3130_p2 }
  0x2f   :  { %3138 = shalt.err (!%p3135_p4)
}
  0x30   :  { %s3139_s3 = scalar_lea.vmem %s91_s27, 128  ;;  %p3144_p6 = scmp.lt.s32.totalorder %s91_s27, %s91_s27 }
  0x31   :  { %p3140_p5 = scmp.ne.s32.totalorder %s91_s27, %s3139_s3  ;;  %p3145_p7 = scmp.lt.s32.totalorder %s3139_s3, %s3139_s3 }
  0x33   :  { %p3146_p8 = por %p3145_p7, %p3144_p6 }
  0x35   :  { %p3147_p9 = pnand %p3146_p8, %p3140_p5 }
  0x37   :  { %3150 = shalt.err (!%p3147_p9)
}
  0x38   :  { %96 = dma.hbm_to_vmem [thread:$0]  %s4514_s5, 128, %s91_s27, [#allocation13], %s3345_s1, %s3345_s1, %s3346_s18  }
  0x39   :  { %s3151_s25 = scalar_lea.hbm %s4516_s7, 3072 }
  0x3a   :  { %p3152_p10 = scmp.ne.s32.totalorder %s4516_s7, %s3151_s25  ;;  %p3155_p11 = scmp.lt.u32.totalorder %s3151_s25, %s4516_s7 }
  0x3c   :  { %p3157_p12 = pnand %p3155_p11, %p3152_p10 }
  0x3e   :  { %3160 = shalt.err (!%p3157_p12)
}
  0x3f   :  { %s3161_s15 = scalar_lea.vmem %s3456_s12, 3072  ;;  %p3166_p0 = scmp.lt.s32.totalorder %s3456_s12, %s3456_s12 }
  0x40   :  { %p3162_p13 = scmp.ne.s32.totalorder %s3456_s12, %s3161_s15  ;;  %p3167_p1 = scmp.lt.s32.totalorder %s3161_s15, %s3161_s15 }
  0x42   :  { %p3168_p2 = por %p3167_p1, %p3166_p0 }
  0x44   :  { %p3169_p3 = pnand %p3168_p2, %p3162_p13 }
  0x46   :  { %3172 = shalt.err (!%p3169_p3)
}
  0x47   :  { %120 = dma.hbm_to_vmem [thread:$0]  %s4516_s7, 3072, %s3456_s12, [#allocation16], %s3345_s1, %s3345_s1, %s3346_s18  }
  0x48   :  { %s3349_s16 = smov [#allocation3]   ;;  %s3350_s19 = smov [#allocation8]  }
  0x49   :  { %s30_s17 = sshll.u32 %s3349_s16, 4  ;;  %s54_s21 = sshll.u32 %s3350_s19, 4  ;;  %s31_s17 = int_to_ptr.vmem [resolvable:$true] %s30_s17  ;;  %s3493_s21 = int_to_ptr.vmem [resolvable:$true] %s54_s21 }
  0x4a   :  { %s3173_s22 = scalar_lea.hbm %s4509_s0, 256 }
  0x4b   :  { %p3174_p4 = scmp.ne.s32.totalorder %s4509_s0, %s3173_s22  ;;  %p3177_p5 = scmp.lt.u32.totalorder %s3173_s22, %s4509_s0 }
  0x4d   :  { %p3179_p6 = pnand %p3177_p5, %p3174_p4 }
  0x4f   :  { %3182 = shalt.err (!%p3179_p6)
}
  0x50   :  { %s3183_s7 = scalar_lea.vmem %s31_s17, 256  ;;  %p3188_p8 = scmp.lt.s32.totalorder %s31_s17, %s31_s17 }
  0x51   :  { %p3184_p7 = scmp.ne.s32.totalorder %s31_s17, %s3183_s7  ;;  %p3189_p9 = scmp.lt.s32.totalorder %s3183_s7, %s3183_s7 }
  0x53   :  { %p3190_p10 = por %p3189_p9, %p3188_p8 }
  0x55   :  { %p3191_p11 = pnand %p3190_p10, %p3184_p7 }
  0x57   :  { %3194 = shalt.err (!%p3191_p11)
}
  0x58   :  { %36 = dma.hbm_to_vmem [thread:$0]  %s4509_s0, 256, %s31_s17, [#allocation4], %s3343_s29, %s3343_s29, %s3344_s30  }
  0x59   :  { %s3195_s15 = scalar_lea.hbm %s4511_s2, 512 }
  0x5a   :  { %p3196_p12 = scmp.ne.s32.totalorder %s4511_s2, %s3195_s15  ;;  %p3199_p13 = scmp.lt.u32.totalorder %s3195_s15, %s4511_s2 }
  0x5c   :  { %p3201_p0 = pnand %p3199_p13, %p3196_p12 }
  0x5e   :  { %3204 = shalt.err (!%p3201_p0)
}
  0x5f   :  { %s3205_s3 = scalar_lea.vmem %s3493_s21, 512  ;;  %p3210_p2 = scmp.lt.s32.totalorder %s3493_s21, %s3493_s21 }
  0x60   :  { %p3206_p1 = scmp.ne.s32.totalorder %s3493_s21, %s3205_s3  ;;  %p3211_p3 = scmp.lt.s32.totalorder %s3205_s3, %s3205_s3 }
  0x62   :  { %p3212_p4 = por %p3211_p3, %p3210_p2 }
  0x64   :  { %p3213_p5 = pnand %p3212_p4, %p3206_p1 }
  0x66   :  { %3216 = shalt.err (!%p3213_p5)
}
  0x67   :  { %60 = dma.hbm_to_vmem [thread:$0]  %s4511_s2, 512, %s3493_s21, [#allocation7], %s3343_s29, %s3343_s29, %s3344_s30  }
  0x68   :  { %s3351_s20 = smov [#allocation11]   ;;  %s3352_s23 = smov [#allocation14]  }
  0x69   :  { %s78_s22 = sshll.u32 %s3351_s20, 4  ;;  %s102_s24 = sshll.u32 %s3352_s23, 4  ;;  %s79_s22 = int_to_ptr.vmem [resolvable:$true] %s78_s22  ;;  %s3530_s24 = int_to_ptr.vmem [resolvable:$true] %s102_s24 }
  0x6a   :  { %s3217_s7 = scalar_lea.hbm %s4513_s4, 512 }
  0x6b   :  { %p3218_p6 = scmp.ne.s32.totalorder %s4513_s4, %s3217_s7  ;;  %p3221_p7 = scmp.lt.u32.totalorder %s3217_s7, %s4513_s4 }
  0x6d   :  { %p3223_p8 = pnand %p3221_p7, %p3218_p6 }
  0x6f   :  { %3226 = shalt.err (!%p3223_p8)
}
  0x70   :  { %s3227_s2 = scalar_lea.vmem %s79_s22, 512  ;;  %p3232_p10 = scmp.lt.s32.totalorder %s79_s22, %s79_s22 }
  0x71   :  { %p3228_p9 = scmp.ne.s32.totalorder %s79_s22, %s3227_s2  ;;  %p3233_p11 = scmp.lt.s32.totalorder %s3227_s2, %s3227_s2 }
  0x73   :  { %p3234_p12 = por %p3233_p11, %p3232_p10 }
  0x75   :  { %p3235_p13 = pnand %p3234_p12, %p3228_p9 }
  0x77   :  { %3238 = shalt.err (!%p3235_p13)
}
  0x78   :  { %84 = dma.hbm_to_vmem [thread:$0]  %s4513_s4, 512, %s79_s22, [#allocation10], %s3345_s1, %s3345_s1, %s3346_s18  }
  0x79   :  { %s3239_s16 = scalar_lea.hbm %s4515_s6, 6144 }
  0x7a   :  { %p3240_p0 = scmp.ne.s32.totalorder %s4515_s6, %s3239_s16  ;;  %p3243_p1 = scmp.lt.u32.totalorder %s3239_s16, %s4515_s6 }
  0x7c   :  { %p3245_p2 = pnand %p3243_p1, %p3240_p0 }
  0x7e   :  { %3248 = shalt.err (!%p3245_p2)
}
  0x7f   :  { %s3249_s20 = scalar_lea.vmem %s3530_s24, 6144  ;;  %p3254_p4 = scmp.lt.s32.totalorder %s3530_s24, %s3530_s24 }
  0x80   :  { %p3250_p3 = scmp.ne.s32.totalorder %s3530_s24, %s3249_s20  ;;  %p3255_p5 = scmp.lt.s32.totalorder %s3249_s20, %s3249_s20 }
  0x82   :  { %p3256_p6 = por %p3255_p5, %p3254_p4 }
  0x84   :  { %p3257_p7 = pnand %p3256_p6, %p3250_p3 }
  0x86   :  { %3260 = shalt.err (!%p3257_p7)
}
  0x87   :  { %108 = dma.hbm_to_vmem [thread:$0]  %s4515_s6, 6144, %s3530_s24, [#allocation13], %s3345_s1, %s3345_s1, %s3346_s18  }
  0x88   :  { %s3353_s23 = smov [#allocation17]   ;;  %s3261_s12 = scalar_lea.hbm %s4517_s8, 128 }
  0x89   :  { %s127_s25 = sshll.u32 %s3353_s23, 4  ;;  %p3262_p8 = scmp.ne.s32.totalorder %s4517_s8, %s3261_s12  ;;  %s128_s25 = int_to_ptr.vmem [resolvable:$true] %s127_s25 }
  0x8a   :  { %p3265_p9 = scmp.lt.u32.totalorder %s3261_s12, %s4517_s8 }
  0x8c   :  { %p3267_p10 = pnand %p3265_p9, %p3262_p8 }
  0x8e   :  { %3270 = shalt.err (!%p3267_p10)
}
  0x8f   :  { %s3271_s21 = scalar_lea.vmem %s128_s25, 128  ;;  %p3276_p12 = scmp.lt.s32.totalorder %s128_s25, %s128_s25 }
  0x90   :  { %p3272_p11 = scmp.ne.s32.totalorder %s128_s25, %s3271_s21  ;;  %p3277_p13 = scmp.lt.s32.totalorder %s3271_s21, %s3271_s21 }
  0x92   :  { %p3278_p0 = por %p3277_p13, %p3276_p12 }
  0x94   :  { %p3279_p1 = pnand %p3278_p0, %p3272_p11 }
  0x96   :  { %3282 = shalt.err (!%p3279_p1)
}
  0x97   :  { %130 = dma.hbm_to_vmem [thread:$0]  %s4517_s8, 128, %s128_s25, [#allocation16]  }
  0x98   :  { %3327 = dma.done.wait [#allocation4], 256  }
  0x99   :  { %3328 = vsyncadd [#allocation4], 4294967040 }
  0x9a   :  { %3329 = dma.done.wait [#allocation7], 768  }
  0x9b   :  { %3330 = vsyncadd [#allocation7], 4294966528 }
  0x9c   :  { %3331 = dma.done.wait [#allocation10], 640  }
  0x9d   :  { %3332 = vsyncadd [#allocation10], 4294966656 }
  0x9e   :  { %3333 = dma.done.wait [#allocation13], 6272  }
  0x9f   :  { %3334 = vsyncadd [#allocation13], 4294961024 }
  0xa0   :  { %3335 = dma.done.wait [#allocation16], 3200  }
  0xa1   :  { %3336 = vsyncadd [#allocation16], 4294964096  ;;  %v3354_v0 = vmov 0.0   ;;  %vm3355_vm0 = vmmov 0   ;;  %v2992_v1 = vld [vmem:[#allocation14] sm:$0xff]   ;;  %v2994_v3 = vld [vmem:[#allocation14 + $0x8] sm:$0xff]   ;;  %v274_v23 = vlaneseq }
  0xa2   :  { %2804 = vmatprep.subr.bf16.mxu0 %v3354_v0  ;;  %2824 = vmatprep.subr.bf16.mxu1 %v3354_v0  ;;  %v2993_v2 = vld [vmem:[#allocation14 + $0x40] sm:$0xff]   ;;  %v2995_v4 = vld [vmem:[#allocation14 + $0x48] sm:$0xff]   ;;  %v2996_v5 = vld [vmem:[#allocation14 + $0x10] sm:$0xff]   ;;  %vm523_vm6 = vcmask 130048  }
  0xa3   :  { %2820 = vmatprep.mubr.msk.bf16.mxu0 %vm3355_vm0, %v3354_v0  ;;  %2840 = vmatprep.mubr.msk.bf16.mxu1 %vm3355_vm0, %v3354_v0  ;;  %v2997_v6 = vld [vmem:[#allocation14 + $0x50] sm:$0xff]   ;;  %v2998_v7 = vld [vmem:[#allocation14 + $0x18] sm:$0xff]   ;;  %v3000_v9 = vld [vmem:[#allocation14 + $0x20] sm:$0xff]   ;;  %v3609_v24 = vshrl.u32 %v274_v23, 7 }
  0xa4   :  { %2805 = vmatpush3.bf16.msra.mxu0 %v2992_v1  ;;  %2825 = vmatpush3.bf16.msra.mxu1 %v2993_v2  ;;  %v2999_v8 = vld [vmem:[#allocation14 + $0x58] sm:$0xff]   ;;  %v3001_v10 = vld [vmem:[#allocation14 + $0x60] sm:$0xff]   ;;  %v3002_v11 = vld [vmem:[#allocation14 + $0x28] sm:$0xff]  }
  0xa5   :  { %2806 = vmatprep.subr.bf16.mxu0 %v3354_v0  ;;  %2826 = vmatprep.subr.bf16.mxu1 %v3354_v0  ;;  %v3003_v12 = vld [vmem:[#allocation14 + $0x68] sm:$0xff]   ;;  %v3004_v13 = vld [vmem:[#allocation14 + $0x30] sm:$0xff]   ;;  %v3006_v15 = vld [vmem:[#allocation14 + $0x38] sm:$0xff]   ;;  %v3612_v25 = vsub.s32 0, %v3609_v24  ;;  %v375_v27 = vsub.s32 1, %v3609_v24 }
  0xa6   :  { %v3005_v14 = vld [vmem:[#allocation14 + $0x70] sm:$0xff]   ;;  %v162_v17 = vld [vmem:[#allocation3 + $0x8] sm:$0xff]  ;;  %v3597_v19 = vld [vmem:[#allocation6] sm:$0xff] }
  0xa7   :  { %v161_v16 = vld [vmem:[#allocation3] sm:$0xff]  ;;  %v3007_v18 = vld [vmem:[#allocation14 + $0x78] sm:$0xff]   ;;  %v3599_v20 = vld [vmem:[#allocation6 + $0x8] sm:$0xff] }
  0xa8   :  { %2807 = vmatpush3.bf16.msra.mxu0 %v2994_v3  ;;  %2827 = vmatpush3.bf16.msra.mxu1 %v2995_v4  ;;  %v272_v21 = vpack.c.bf16 %v162_v17, %v161_v16  ;;  %v273_v22 = vpack.c.bf16 %v3599_v20, %v3597_v19  ;;  %v3614_v26 = vld [vmem:[#allocation17] sm:$0x7f]  ;;  %v2692_v52 = vld [vmem:[#allocation9] sm:$0xff]  }
  0xa9   :  { %2808 = vmatprep.subr.bf16.mxu0 %v3354_v0  ;;  %2828 = vmatprep.subr.bf16.mxu1 %v3354_v0  ;;  %v277_v28 = vrot.slane %v3614_v26, %v3612_v25  ;;  %v376_v29 = vrot.slane %v3614_v26, %v375_v27  ;;  %v2693_v53 = vunpack.c.l.bf16 %v2692_v52  ;;  %v2694_v54 = vunpack.c.h.bf16 %v2692_v52 }
  0xab   :  { %vm519_vm5 = vcmp.gt.f32.partialorder %v2693_v53, 0.0  ;;  %vm3624_vm7 = vcmp.gt.f32.partialorder %v2694_v54, 0.0 }
  0xac   :  { %2809 = vmatpush3.bf16.msra.mxu0 %v2996_v5  ;;  %2829 = vmatpush3.bf16.msra.mxu1 %v2997_v6 }
  0xad   :  { %2810 = vmatprep.subr.bf16.mxu0 %v3354_v0  ;;  %2830 = vmatprep.subr.bf16.mxu1 %v3354_v0 }
  0xb0   :  { %2811 = vmatpush3.bf16.msra.mxu0 %v2998_v7  ;;  %2831 = vmatpush3.bf16.msra.mxu1 %v2999_v8 }
  0xb1   :  { %2812 = vmatprep.subr.bf16.mxu0 %v3354_v0  ;;  %2832 = vmatprep.subr.bf16.mxu1 %v3354_v0 }
  0xb4   :  { %2813 = vmatpush3.bf16.msra.mxu0 %v3000_v9  ;;  %2833 = vmatpush3.bf16.msra.mxu1 %v3001_v10 }
  0xb5   :  { %2814 = vmatprep.subr.bf16.mxu0 %v3354_v0  ;;  %2834 = vmatprep.subr.bf16.mxu1 %v3354_v0 }
  0xb8   :  { %2815 = vmatpush3.bf16.msra.mxu0 %v3002_v11  ;;  %2835 = vmatpush3.bf16.msra.mxu1 %v3003_v12 }
  0xb9   :  { %2816 = vmatprep.subr.bf16.mxu0 %v3354_v0  ;;  %2836 = vmatprep.subr.bf16.mxu1 %v3354_v0 }
  0xbc   :  { %2817 = vmatpush3.bf16.msra.mxu0 %v3004_v13  ;;  %2837 = vmatpush3.bf16.msra.mxu1 %v3005_v14 }
  0xbd   :  { %2818 = vmatprep.subr.bf16.mxu0 %v3354_v0  ;;  %2838 = vmatprep.subr.bf16.mxu1 %v3354_v0 }
  0xc0   :  { %2819 = vmatpush3.bf16.msra.mxu0 %v3006_v15  ;;  %2839 = vmatpush3.bf16.msra.mxu1 %v3007_v18 }
  0xc1   :  { %2844 = vmatprep.subr.bf16.mxu0 %v3354_v0 }
  0xc3   :  { %2821 = vmatmul.mubr.bf16.vlgmr.msra.gmra.mrb[0].mxu0 %v272_v21  ;;  %2841 = vmatmul.mubr.bf16.vlgmr.msra.gmra.mrb[0].mxu1 %v273_v22 }
  0xc4   :  { %2846 = vmatprep.mubr.msk.bf16.mxu0 %vm3355_vm0, %v3354_v0 }
 0x196   :  { %v360_v30 = vpop.f32.mrb[0].mxu0  ;;  %v459_v33 = vpop.f32.mrb[0].mxu1 }
 0x197   :  { %v361_v31 = vadd.f32 %v360_v30, %v277_v28  ;;  %v2822_v32 = vpop.f32.mrb[1].mxu0  ;;  %v460_v35 = vadd.f32 %v459_v33, %v376_v29  ;;  %v2842_v36 = vpop.f32.mrb[1].mxu1  ;;  %v3011_v33 = vld [vmem:[#allocation14 + $0x98] sm:$0xff]  }
 0x198   :  { %v363_v34 = vpop.f32.mrb[2].mxu0  ;;  %v462_v40 = vpop.f32.mrb[2].mxu1  ;;  %v3010_v32 = vld [vmem:[#allocation14 + $0x90] sm:$0xff]  }
 0x199   :  { %v369_v37 = vmul.f32 0.01, %v361_v31  ;;  %v364_v38 = vadd.f32 %v363_v34, %v277_v28  ;;  %v2823_v39 = vpop.f32.mrb[3].mxu0  ;;  %vm367_vm1 = vcmp.ge.f32.partialorder %v361_v31, 0.0  ;;  %vm466_vm2 = vcmp.ge.f32.partialorder %v460_v35, 0.0  ;;  %v2843_v43 = vpop.f32.mrb[3].mxu1 }
 0x19a   :  { %v468_v41 = vmul.f32 0.01, %v460_v35  ;;  %v463_v42 = vadd.f32 %v462_v40, %v376_v29  ;;  %v3008_v29 = vld [vmem:[#allocation14 + $0x80] sm:$0xff]   ;;  %v3014_v36 = vld [vmem:[#allocation14 + $0xb0] sm:$0xff]   ;;  %v3016_v43 = vld [vmem:[#allocation11] sm:$0xff]  }
 0x19b   :  { %vm368_vm3 = vcmp.ge.f32.partialorder %v364_v38, 0.0  ;;  %v370_v44 = vmul.f32 0.01, %v364_v38  ;;  %v371_v47 = vsel %vm367_vm1, %v361_v31, %v369_v37  ;;  %v3009_v31 = vld [vmem:[#allocation14 + $0x88] sm:$0xff]   ;;  %v3012_v34 = vld [vmem:[#allocation14 + $0xa0] sm:$0xff]   ;;  %v3015_v37 = vld [vmem:[#allocation14 + $0xb8] sm:$0xff]   ;;  %2878 = vmatprep.mubr.msk.bf16.mxu1 %vm523_vm6, %v3016_v43 }
 0x19c   :  { %v470_v45 = vsel %vm466_vm2, %v460_v35, %v468_v41  ;;  %vm467_vm4 = vcmp.ge.f32.partialorder %v463_v42, 0.0  ;;  %v469_v46 = vmul.f32 0.01, %v463_v42  ;;  %v3013_v35 = vld [vmem:[#allocation14 + $0xa8] sm:$0xff]  }
 0x19d   :  { %v372_v48 = vsel %vm368_vm3, %v364_v38, %v370_v44  ;;  %v3024_v44 = vld [vmem:[#allocation15 + $0x80] sm:$0xff]  }
 0x19e   :  { %v473_v49 = vpack.c.bf16 %v372_v48, %v371_v47  ;;  %v471_v50 = vsel %vm467_vm4, %v463_v42, %v469_v46  ;;  %v3030_v46 = vld [vmem:[#allocation15 + $0x90] sm:$0xff]   ;;  %v3033_v47 = vld [vmem:[#allocation15 + $0x98] sm:$0xff]   ;;  %v600_v48 = vsub.s32 2, %v3609_v24 }
 0x19f   :  { %v472_v51 = vpack.c.bf16 %v471_v50, %v470_v45  ;;  %v3027_v45 = vld [vmem:[#allocation15 + $0x88] sm:$0xff]  }
 0x1a0   :  { %2845 = vmatpush3.bf16.xpose.msra.mxu0 %v473_v49  ;;  %v601_v49 = vrot.slane %v3614_v26, %v600_v48  ;;  %v3048_v48 = vld [vmem:[#allocation14 + $0xe0] sm:$0xff]  }
 0x1a1   :  { %2850 = vmatprep.subr.bf16.mxu0 %v3354_v0 }
 0x1a7   :  { %2847 = vmatmul.mubr.bf16.vlgmr.msra.gmra.mrb[4].mxu0 %v472_v51 }
 0x1a8   :  { %2851 = vmatpush3.bf16.msra.mxu0 %v272_v21  ;;  %2852 = vmatprep.mubr.msk.bf16.mxu0 %vm3355_vm0, %v3354_v0 }
 0x1a9   :  { %2856 = vmatprep.subr.bf16.mxu0 %v3354_v0 }
 0x27a   :  { %v508_v55 = vpop.f32.mrb[4].mxu0 }
 0x27b   :  { %v2848_v57 = vpop.f32.mrb[5].mxu0  ;;  %v521_v58 = vsel %vm519_vm5, %v508_v55, -1e+30 }
 0x27c   :  { %v511_v59 = vpop.f32.mrb[6].mxu0  ;;  %v524_v60 = vsel %vm523_vm6, %v521_v58, -inf }
 0x27d   :  { %525 = vmax.xlane.f32.xlu0 %v524_v60  ;;  %v2849_v61 = vpop.f32.mrb[7].mxu0  ;;  %v522_v62 = vsel %vm3624_vm7, %v511_v59, -1e+30  ;;  %v3017_v60 = vld [vmem:[#allocation11 + $0x8] sm:$0xff]  }
 0x27e   :  { %v527_v63 = vsel %vm523_vm6, %v522_v62, -inf  ;;  %v3018_v61 = vld [vmem:[#allocation11 + $0x10] sm:$0xff]   ;;  %v3021_v62 = vld [vmem:[#allocation15] sm:$0xff]  }
 0x281   :  { %528 = vmax.xlane.f32.xlu0 %v527_v63  ;;  %v3022_v63 = vld [vmem:[#allocation15 + $0x48] sm:$0xff]  }
 0x30a   :  { %v526_v1 = vpop.xlane.xlu0 %525 }
 0x30b   :  { %v530_v2 = vsub.f32 %v508_v55, %v526_v1  ;;  %v3019_v1 = vld [vmem:[#allocation11 + $0x18] sm:$0xff]  }
 0x30d   :  { %v532_v3 = vsel %vm519_vm5, %v530_v2, -1e+30  ;;  %v3026_v2 = vld [vmem:[#allocation15 + $0x10] sm:$0xff]  }
 0x30e   :  { %v534_v4 = vmul.f32 1.442695, %v532_v3  ;;  %v529_v5 = vpop.xlane.xlu0 %528  ;;  %v3028_v3 = vld [vmem:[#allocation15 + $0x58] sm:$0xff]  }
 0x30f   :  { %v531_v6 = vsub.f32 %v511_v59, %v529_v5  ;;  %v3020_v59 = vld [vmem:[#allocation15 + $0x40] sm:$0xff]  }
 0x310   :  { %3068 = vpow2.f32 %v534_v4  ;;  %v3029_v4 = vld [vmem:[#allocation15 + $0x18] sm:$0xff]   ;;  %v3031_v5 = vld [vmem:[#allocation15 + $0x60] sm:$0xff]  }
 0x311   :  { %v533_v7 = vsel %vm3624_vm7, %v531_v6, -1e+30  ;;  %v3032_v6 = vld [vmem:[#allocation15 + $0x20] sm:$0xff]  }
 0x312   :  { %v536_v8 = vmul.f32 1.442695, %v533_v7  ;;  %v3034_v7 = vld [vmem:[#allocation15 + $0x68] sm:$0xff]  }
 0x314   :  { %3070 = vpow2.f32 %v536_v8  ;;  %v3035_v8 = vld [vmem:[#allocation15 + $0x28] sm:$0xff]  }
 0x31a   :  { %v3069_v9 = vpop.eup %3068 }
 0x31b   :  { %v538_v10 = vmul.f32 %v3069_v9, %v2693_v53  ;;  %v3036_v9 = vld [vmem:[#allocation15 + $0xa0] sm:$0xff]  }
 0x31d   :  { %v540_v11 = vsel %vm523_vm6, %v538_v10, 0.0 }
 0x31e   :  { %v3071_v12 = vpop.eup %3070  ;;  %541 = vadd.xlane.f32.xlu1 %v540_v11  ;;  %v3038_v11 = vld [vmem:[#allocation15 + $0x30] sm:$0xff]  }
 0x31f   :  { %v539_v13 = vmul.f32 %v3071_v12, %v2694_v54  ;;  %v3039_v12 = vld [vmem:[#allocation15 + $0xa8] sm:$0xff]  }
 0x321   :  { %v543_v14 = vsel %vm523_vm6, %v539_v13, 0.0 }
 0x322   :  { %544 = vadd.xlane.f32.xlu1 %v543_v14  ;;  %v3041_v14 = vld [vmem:[#allocation15 + $0x38] sm:$0xff]  }
 0x3ab   :  { %v542_v15 = vpop.xlane.xlu1 %541 }
 0x3ac   :  { %v546_v16 = vadd.f32 1e-06, %v542_v15  ;;  %v3042_v15 = vld [vmem:[#allocation15 + $0xb0] sm:$0xff]  }
 0x3ae   :  { %3072 = vrcp.f32 %v546_v16  ;;  %v3043_v16 = vld [vmem:[#allocation15 + $0xb8] sm:$0xff]  }
 0x3af   :  { %v545_v17 = vpop.xlane.xlu1 %544 }
 0x3b0   :  { %v547_v18 = vadd.f32 1e-06, %v545_v17  ;;  %v165_v17 = vld [vmem:[#allocation8] sm:$0xff] }
 0x3b2   :  { %3074 = vrcp.f32 %v547_v18  ;;  %v166_v18 = vld [vmem:[#allocation8 + $0x8] sm:$0xff] }
 0x3b8   :  { %v3073_v21 = vpop.eup %3072 }
 0x3b9   :  { %v550_v27 = vmul.f32 %v3073_v21, %v538_v10  ;;  %v3037_v10 = vld [vmem:[#allocation15 + $0x70] sm:$0xff]   ;;  %v801_v21 = vpack.c.bf16 %v166_v18, %v165_v17 }
 0x3bc   :  { %v3075_v22 = vpop.eup %3074 }
 0x3bd   :  { %v551_v28 = vmul.f32 %v3075_v22, %v539_v13  ;;  %v3040_v13 = vld [vmem:[#allocation15 + $0x78] sm:$0xff]   ;;  %v167_v22 = vld [vmem:[#allocation8 + $0x10] sm:$0xff] }
 0x3bf   :  { %v552_v30 = vpack.c.bf16 %v551_v28, %v550_v27  ;;  %v168_v27 = vld [vmem:[#allocation8 + $0x18] sm:$0xff] }
 0x3c0   :  { %v804_v28 = vpack.c.bf16 %v168_v27, %v167_v22 }
 0x3c1   :  { %2853 = vmatmul.mubr.msk.bf16.vlgmr.msra.gmra.mrb[8].mxu0 %vm523_vm6, %v552_v30  ;;  %v3053_v30 = vld [vmem:[#allocation14 + $0x108] sm:$0xff]  }
 0x3c2   :  { %2857 = vmatpush3.bf16.msra.mxu0 %v3008_v29  ;;  %2872 = vmatprep.mubr.msk.bf16.mxu0 %vm3355_vm0, %v3354_v0  ;;  %v3052_v29 = vld [vmem:[#allocation14 + $0x100] sm:$0xff]  }
 0x3c3   :  { %2858 = vmatprep.subr.bf16.mxu0 %v3354_v0 }
 0x3c6   :  { %2859 = vmatpush3.bf16.msra.mxu0 %v3009_v31  ;;  %v3054_v31 = vld [vmem:[#allocation14 + $0x110] sm:$0xff]  }
 0x3c7   :  { %2860 = vmatprep.subr.bf16.mxu0 %v3354_v0 }
 0x3ca   :  { %2861 = vmatpush3.bf16.msra.mxu0 %v3010_v32 }
 0x3cb   :  { %2862 = vmatprep.subr.bf16.mxu0 %v3354_v0 }
 0x3ce   :  { %2863 = vmatpush3.bf16.msra.mxu0 %v3011_v33 }
 0x3cf   :  { %2864 = vmatprep.subr.bf16.mxu0 %v3354_v0 }
 0x3d2   :  { %2865 = vmatpush3.bf16.msra.mxu0 %v3012_v34 }
 0x3d3   :  { %2866 = vmatprep.subr.bf16.mxu0 %v3354_v0 }
 0x3d6   :  { %2867 = vmatpush3.bf16.msra.mxu0 %v3013_v35 }
 0x3d7   :  { %2868 = vmatprep.subr.bf16.mxu0 %v3354_v0 }
 0x3da   :  { %2869 = vmatpush3.bf16.msra.mxu0 %v3014_v36 }
 0x3db   :  { %2870 = vmatprep.subr.bf16.mxu0 %v3354_v0 }
 0x3de   :  { %2871 = vmatpush3.bf16.msra.mxu0 %v3015_v37 }
 0x3df   :  { %2886 = vmatprep.subr.bf16.mxu0 %v3024_v44 }
 0x494   :  { %v590_v38 = vpop.f32.mrb[8].mxu0 }
 0x495   :  { %v2854_v39 = vpop.f32.mrb[9].mxu0 }
 0x496   :  { %v593_v40 = vpop.f32.mrb[10].mxu0 }
 0x497   :  { %v597_v41 = vpack.c.bf16 %v593_v40, %v590_v38  ;;  %v2855_v42 = vpop.f32.mrb[11].mxu0 }
 0x499   :  { %2873 = vmatmul.mubr.bf16.vlgmr.msra.gmra.mrb[12].mxu0 %v597_v41 }
 0x49a   :  { %2887 = vmatpush3.bf16.msra.mxu0 %v3024_v44  ;;  %2902 = vmatprep.mubr.bf16.mxu0 %v801_v21  ;;  %v3044_v44 = vld [vmem:[#allocation14 + $0xc0] sm:$0xff]  }
 0x49b   :  { %2888 = vmatprep.subr.bf16.mxu0 %v3027_v45 }
 0x49e   :  { %2889 = vmatpush3.bf16.msra.mxu0 %v3027_v45  ;;  %v3045_v45 = vld [vmem:[#allocation14 + $0xc8] sm:$0xff]  }
 0x49f   :  { %2890 = vmatprep.subr.bf16.mxu0 %v3030_v46 }
 0x4a2   :  { %2891 = vmatpush3.bf16.msra.mxu0 %v3030_v46  ;;  %v3046_v46 = vld [vmem:[#allocation14 + $0xd0] sm:$0xff]  }
 0x4a3   :  { %2892 = vmatprep.subr.bf16.mxu0 %v3033_v47 }
 0x4a6   :  { %2893 = vmatpush3.bf16.msra.mxu0 %v3033_v47  ;;  %v3047_v47 = vld [vmem:[#allocation14 + $0xd8] sm:$0xff]  }
 0x4a7   :  { %2894 = vmatprep.subr.bf16.mxu0 %v3036_v9 }
 0x4aa   :  { %2895 = vmatpush3.bf16.msra.mxu0 %v3036_v9 }
 0x4ab   :  { %2896 = vmatprep.subr.bf16.mxu0 %v3039_v12 }
 0x4ae   :  { %2897 = vmatpush3.bf16.msra.mxu0 %v3039_v12 }
 0x4af   :  { %2898 = vmatprep.subr.bf16.mxu0 %v3042_v15 }
 0x4b2   :  { %2899 = vmatpush3.bf16.msra.mxu0 %v3042_v15 }
 0x4b3   :  { %2900 = vmatprep.subr.bf16.mxu0 %v3043_v16 }
 0x4b6   :  { %2901 = vmatpush3.bf16.msra.mxu0 %v3043_v16 }
 0x4b7   :  { %2926 = vmatprep.subr.bf16.mxu0 %v3052_v29 }
 0x4b9   :  { %2903 = vmatmul.mubr.bf16.vlgmr.msra.gmra.mrb[16].mxu0 %v804_v28 }
 0x4ba   :  { %2927 = vmatpush3.bf16.msra.mxu0 %v3052_v29 }
 0x4bb   :  { %2928 = vmatprep.subr.bf16.mxu0 %v3053_v30 }
 0x4be   :  { %2929 = vmatpush3.bf16.msra.mxu0 %v3053_v30 }
 0x4bf   :  { %2930 = vmatprep.subr.bf16.mxu0 %v3054_v31 }
 0x4c2   :  { %2931 = vmatpush3.bf16.msra.mxu0 %v3054_v31 }
 0x56c   :  { %v684_v50 = vpop.f32.mrb[12].mxu0 }
 0x56d   :  { %v685_v51 = vadd.f32 %v684_v50, %v601_v49  ;;  %v2874_v52 = vpop.f32.mrb[13].mxu0  ;;  %v3050_v50 = vld [vmem:[#allocation14 + $0xf0] sm:$0xff]  }
 0x56e   :  { %v687_v53 = vpop.f32.mrb[14].mxu0  ;;  %v3055_v52 = vld [vmem:[#allocation14 + $0x118] sm:$0xff]  }
 0x56f   :  { %v688_v54 = vadd.f32 %v687_v53, %v601_v49  ;;  %v2875_v55 = vpop.f32.mrb[15].mxu0  ;;  %v3650_v56 = vadd.f32 %v685_v51, %v3597_v19  ;;  %v3023_v19 = vld [vmem:[#allocation15 + $0x8] sm:$0xff]   ;;  %v3051_v51 = vld [vmem:[#allocation14 + $0xf8] sm:$0xff]   ;;  %2932 = vmatprep.subr.bf16.mxu0 %v3055_v52  ;;  %v3056_v53 = vld [vmem:[#allocation14 + $0x120] sm:$0xff]  }
 0x570   :  { %v3049_v49 = vld [vmem:[#allocation14 + $0xe8] sm:$0xff]   ;;  %2933 = vmatpush3.bf16.msra.mxu0 %v3055_v52 }
 0x571   :  { %v3653_v57 = vadd.f32 %v688_v54, %v3599_v20  ;;  %v3025_v20 = vld [vmem:[#allocation15 + $0x50] sm:$0xff]   ;;  %2934 = vmatprep.subr.bf16.mxu0 %v3056_v53 }
 0x573   :  { %v3657_v58 = vpack.c.bf16 %v3653_v57, %v3650_v56 }
 0x574   :  { %2935 = vmatpush3.bf16.msra.mxu0 %v3056_v53 }
 0x575   :  { %2876 = vmatprep.subr.bf16.mxu1 %v3657_v58 }
 0x576   :  { %2877 = vmatpush3.bf16.msra.mxu1 %v3657_v58 }
 0x577   :  { %2735 = vmatprep.subr.bf16.mxu1 %v3020_v59 }
 0x579   :  { %2879 = vmatmul.mubr.msk.bf16.vlgmr.msra.gmra.mrb[4].mxu1 %vm523_vm6, %v3017_v60  ;;  %v3057_v60 = vld [vmem:[#allocation14 + $0x128] sm:$0xff]  }
 0x57a   :  { %2882 = vmatprep.mubr.msk.bf16.mxu1 %vm523_vm6, %v3018_v61  ;;  %2736 = vmatpush3.bf16.msra.mxu1 %v3021_v62  ;;  %v3058_v62 = vld [vmem:[#allocation14 + $0x130] sm:$0xff]  }
 0x57b   :  { %2737 = vmatprep.subr.bf16.mxu1 %v3022_v63  ;;  %2936 = vmatprep.subr.bf16.mxu0 %v3057_v60  ;;  %v855_v63 = vsub.s32 3, %v3609_v24 }
 0x57c   :  { %2937 = vmatpush3.bf16.msra.mxu0 %v3057_v60 }
 0x57d   :  { %2938 = vmatprep.subr.bf16.mxu0 %v3058_v62 }
 0x57e   :  { %2738 = vmatpush3.bf16.msra.mxu1 %v3023_v19 }
 0x57f   :  { %2739 = vmatprep.subr.bf16.mxu1 %v3025_v20  ;;  %v856_v20 = vrot.slane %v3614_v26, %v855_v63 }
 0x580   :  { %2939 = vmatpush3.bf16.msra.mxu0 %v3058_v62 }
 0x581   :  { %2883 = vmatmul.mubr.msk.bf16.gmra.mrb[8].mxu1 %vm523_vm6, %v3019_v1 }
 0x582   :  { %2740 = vmatpush3.bf16.msra.mxu1 %v3026_v2 }
 0x583   :  { %2741 = vmatprep.subr.bf16.mxu1 %v3028_v3 }
 0x586   :  { %2742 = vmatpush3.bf16.msra.mxu1 %v3029_v4 }
 0x587   :  { %2743 = vmatprep.subr.bf16.mxu1 %v3031_v5 }
 0x58a   :  { %2744 = vmatpush3.bf16.msra.mxu1 %v3032_v6 }
 0x58b   :  { %2745 = vmatprep.subr.bf16.mxu1 %v3034_v7 }
 0x58c   :  { %v2904_v54 = vpop.f32.mrb[16].mxu0 }
 0x58d   :  { %v1084_v55 = vpop.f32.mrb[17].mxu0 }
 0x58e   :  { %2746 = vmatpush3.bf16.msra.mxu1 %v3035_v8  ;;  %v2905_v59 = vpop.f32.mrb[18].mxu0 }
 0x58f   :  { %2747 = vmatprep.subr.bf16.mxu1 %v3037_v10  ;;  %v1087_v61 = vpop.f32.mrb[19].mxu0 }
 0x592   :  { %2748 = vmatpush3.bf16.msra.mxu1 %v3038_v11 }
 0x593   :  { %2749 = vmatprep.subr.bf16.mxu1 %v3040_v13 }
 0x596   :  { %2750 = vmatpush3.bf16.msra.mxu1 %v3041_v14 }
 0x597   :  { %2906 = vmatprep.subr.bf16.mxu1 %v3354_v0 }
 0x64c   :  { %v2880_v32 = vpop.f32.mrb[4].mxu1 }
 0x64d   :  { %v768_v33 = vpop.f32.mrb[5].mxu1 }
 0x64e   :  { %v2881_v34 = vpop.f32.mrb[6].mxu1 }
 0x64f   :  { %v802_v35 = vpack.c.bf16 %v2881_v34, %v2880_v32  ;;  %v771_v36 = vpop.f32.mrb[7].mxu1  ;;  %v1101_v32 = vsub.s32 4, %v3609_v24 }
 0x650   :  { %v799_v37 = vpack.c.bf16 %v771_v36, %v768_v33  ;;  %v3356_v33 = vmov 1966171168  }
 0x651   :  { %v1295_v34 = vunpack.c.l.s4 %v3356_v33 }
 0x653   :  { %v1296_v36 = vunpack.c.0.s8 %v1295_v34 }
 0x654   :  { %v2884_v38 = vpop.f32.mrb[8].mxu1 }
 0x655   :  { %v784_v39 = vpop.f32.mrb[9].mxu1 }
 0x656   :  { %v2885_v40 = vpop.f32.mrb[10].mxu1 }
 0x657   :  { %v803_v41 = vpack.c.bf16 %v2885_v40, %v2884_v38  ;;  %v787_v42 = vpop.f32.mrb[11].mxu1  ;;  %v3685_v38 = vsub.s32 %v1296_v36, %v3609_v24 }
 0x658   :  { %v800_v43 = vpack.c.bf16 %v787_v42, %v784_v39 }
 0x65a   :  { %1033 = vmatprep.mubr.bf16.mxu1 %v800_v43 }
 0x65b   :  { %1034 = vmatmul.mubr.bf16.vlgmr.msra.gmra.mrb[12].mxu1 %v799_v37 }
 0x65c   :  { %2907 = vmatpush3.bf16.msra.mxu1 %v3044_v44  ;;  %1041 = vmatprep.mubr.bf16.mxu1 %v803_v41 }
 0x65d   :  { %2908 = vmatprep.subr.bf16.mxu1 %v3354_v0 }
 0x660   :  { %2909 = vmatpush3.bf16.msra.mxu1 %v3045_v45 }
 0x661   :  { %2910 = vmatprep.subr.bf16.mxu1 %v3354_v0 }
 0x663   :  { %1042 = vmatmul.mubr.bf16.gmra.mrb[16].mxu1 %v802_v35  ;;  %v1102_v35 = vrot.slane %v3614_v26, %v1101_v32 }
 0x664   :  { %2911 = vmatpush3.bf16.msra.mxu1 %v3046_v46  ;;  %2922 = vmatprep.mubr.msk.bf16.mxu1 %vm3355_vm0, %v3354_v0 }
 0x665   :  { %2912 = vmatprep.subr.bf16.mxu1 %v3354_v0 }
 0x668   :  { %2913 = vmatpush3.bf16.msra.mxu1 %v3047_v47 }
 0x669   :  { %2914 = vmatprep.subr.bf16.mxu1 %v3354_v0 }
 0x66c   :  { %2915 = vmatpush3.bf16.msra.mxu1 %v3048_v48  ;;  %v1601_v48 = vsub.s32 6, %v3609_v24 }
 0x66d   :  { %2916 = vmatprep.subr.bf16.mxu1 %v3354_v0 }
 0x66e   :  { %v3698_v53 = vrot.slane %v3614_v26, %v1601_v48 }
 0x670   :  { %2917 = vmatpush3.bf16.msra.mxu1 %v3049_v49 }
 0x671   :  { %2918 = vmatprep.subr.bf16.mxu1 %v3354_v0 }
 0x674   :  { %2919 = vmatpush3.bf16.msra.mxu1 %v3050_v50 }
 0x675   :  { %2920 = vmatprep.subr.bf16.mxu1 %v3354_v0 }
 0x678   :  { %2921 = vmatpush3.bf16.msra.mxu1 %v3051_v51 }
 0x679   :  { %2946 = vmatprep.subr.bf16.mxu1 %v3354_v0 }
 0x67b   :  { %2923 = vmatmul.mubr.bf16.vlgmr.msra.gmra.mrb[20].mxu1 %v3657_v58  ;;  %v3059_v58 = vld [vmem:[#allocation14 + $0x138] sm:$0xff]  }
 0x67c   :  { %2950 = vmatprep.mubr.msk.bf16.mxu1 %vm3355_vm0, %v3354_v0  ;;  %2940 = vmatprep.subr.bf16.mxu0 %v3059_v58 }
 0x67d   :  { %2941 = vmatpush3.bf16.msra.mxu0 %v3059_v58 }
 0x72e   :  { %v2751_v19 = vpop.f32.mrb[12].mxu1 }
 0x72f   :  { %v2752_v1 = vpop.f32.mrb[13].mxu1 }
 0x730   :  { %v2753_v2 = vadd.f32 %v2752_v1, %v2751_v19  ;;  %v2754_v3 = vpop.f32.mrb[14].mxu1 }
 0x731   :  { %v2755_v4 = vpop.f32.mrb[15].mxu1 }
 0x732   :  { %v2756_v5 = vadd.f32 %v2755_v4, %v2754_v3  ;;  %v1036_v6 = vadd.f32 %v2753_v2, %v856_v20 }
 0x734   :  { %v1085_v7 = vadd.f32 %v1084_v55, %v1036_v6  ;;  %v1039_v8 = vadd.f32 %v2756_v5, %v856_v20 }
 0x736   :  { %2568 = vst [vmem:[#allocation19] sm:$0xff] %v1085_v7  ;;  %v1088_v9 = vadd.f32 %v1087_v61, %v1039_v8  ;;  %v2757_v10 = vpop.f32.mrb[16].mxu1 }
 0x737   :  { %v2758_v11 = vpop.f32.mrb[17].mxu1 }
 0x738   :  { %v1192_v12 = vpack.c.bf16 %v1088_v9, %v1085_v7  ;;  %2569 = vst [vmem:[#allocation19 + $0x8] sm:$0xff] %v1088_v9  ;;  %v2759_v13 = vadd.f32 %v2758_v11, %v2757_v10  ;;  %v2760_v14 = vpop.f32.mrb[18].mxu1 }
 0x739   :  { %v2761_v15 = vpop.f32.mrb[19].mxu1 }
 0x73a   :  { %v1044_v16 = vadd.f32 %v2759_v13, %v856_v20  ;;  %v2762_v17 = vadd.f32 %v2761_v15, %v2760_v14  ;;  %2942 = vmatprep.mubr.bf16.mxu0 %v1192_v12  ;;  %2947 = vmatpush3.bf16.msra.mxu1 %v1192_v12 }
 0x73b   :  { %2948 = vmatprep.subr.bf16.mxu1 %v3354_v0 }
 0x73c   :  { %v1093_v18 = vadd.f32 %v2904_v54, %v1044_v16  ;;  %v1047_v21 = vadd.f32 %v2762_v17, %v856_v20 }
 0x73e   :  { %2570 = vst [vmem:[#allocation19 + $0x10] sm:$0xff] %v1093_v18  ;;  %v1096_v22 = vadd.f32 %v2905_v59, %v1047_v21 }
 0x740   :  { %v1193_v27 = vpack.c.bf16 %v1096_v22, %v1093_v18  ;;  %2571 = vst [vmem:[#allocation19 + $0x18] sm:$0xff] %v1096_v22 }
 0x742   :  { %2943 = vmatmul.mubr.bf16.vlgmr.msra.gmra.mrb[20].mxu0 %v1193_v27  ;;  %2949 = vmatpush3.bf16.msra.mxu1 %v1193_v27 }
 0x743   :  { %2954 = vmatprep.subr.bf16.mxu1 %v3354_v0 }
 0x74e   :  { %v1185_v28 = vpop.f32.mrb[20].mxu1 }
 0x74f   :  { %v2924_v29 = vpop.f32.mrb[21].mxu1  ;;  %v1186_v37 = vadd.f32 %v1185_v28, %v1102_v35 }
 0x750   :  { %v1188_v30 = vpop.f32.mrb[22].mxu1 }
 0x751   :  { %v2925_v31 = vpop.f32.mrb[23].mxu1  ;;  %v3687_v39 = vadd.f32 %v1188_v30, %v1102_v35  ;;  %v1300_v40 = vrot.slane %v1186_v37, %v3685_v38  ;;  %v1293_v54 = vcombine.high %v1186_v37, %v1186_v37 }
 0x753   :  { %v1349_v41 = vrot.slane %v3687_v39, %v3685_v38  ;;  %v1308_v42 = vcombine.high %v1300_v40, %v1300_v40  ;;  %v1316_v44 = vrot.slane %v1300_v40, %v3685_v38  ;;  %v1307_v18 = vrot.slane %v1293_v54, %v3685_v38 }
 0x754   :  { %v1342_v27 = vcombine.high %v3687_v39, %v3687_v39 }
 0x755   :  { %v1357_v43 = vcombine.high %v1349_v41, %v1349_v41  ;;  %v1330_v45 = vrot.slane %v1308_v42, %v3685_v38  ;;  %v1365_v46 = vrot.slane %v1349_v41, %v3685_v38  ;;  %v1338_v49 = vcombine.high %v1316_v44, %v1316_v44 }
 0x756   :  { %v3701_v55 = vrot.slane %v1316_v44, %v3612_v25  ;;  %v1309_v37 = vcombine.high %v1307_v18, %v1307_v18  ;;  %v1356_v39 = vrot.slane %v1342_v27, %v3685_v38  ;;  %v1323_v42 = vrot.slane %v1307_v18, %v3685_v38 }
 0x757   :  { %v1379_v47 = vrot.slane %v1357_v43, %v3685_v38  ;;  %v1340_v50 = vcombine.high %v1330_v45, %v1330_v45  ;;  %v1387_v51 = vcombine.high %v1365_v46, %v1365_v46  ;;  %v3704_v59 = vrot.slane %v1330_v45, %v3612_v25 }
 0x758   :  { %v3707_v60 = vrot.slane %v1365_v46, %v3612_v25  ;;  %v3713_v62 = vrot.slane %v1338_v49, %v3612_v25  ;;  %v1337_v49 = vrot.slane %v1309_v37, %v3685_v38  ;;  %v3780_v54 = vrot.slane %v1323_v42, %v3612_v25 }
 0x759   :  { %v1389_v52 = vcombine.high %v1379_v47, %v1379_v47  ;;  %v3710_v61 = vrot.slane %v1379_v47, %v3612_v25  ;;  %v3716_v58 = vrot.slane %v1340_v50, %v3612_v25  ;;  %v3719_v26 = vrot.slane %v1387_v51, %v3612_v25 }
 0x75a   :  { %v1358_v50 = vcombine.high %v1356_v39, %v1356_v39 }
 0x75b   :  { %v3722_v63 = vrot.slane %v1389_v52, %v3612_v25 }
 0x815   :  { %v3724_v19 = vpop.f32.mrb[20].mxu0 }
 0x816   :  { %v3726_v20 = vpop.f32.mrb[21].mxu0  ;;  %v1732_v1 = vadd.f32 %v3724_v19, %v3701_v55  ;;  %v1734_v2 = vadd.f32 %v3724_v19, %v3704_v59  ;;  %v1748_v3 = vadd.f32 %v3724_v19, %v3707_v60  ;;  %v1750_v4 = vadd.f32 %v3724_v19, %v3710_v61 }
 0x817   :  { %v3736_v5 = vpop.f32.mrb[22].mxu0  ;;  %v1736_v6 = vadd.f32 %v3724_v19, %v3713_v62  ;;  %v3742_v7 = vadd.f32 %v3724_v19, %v3719_v26  ;;  %v3746_v8 = vadd.f32 %v3724_v19, %v3716_v58  ;;  %v3750_v9 = vadd.f32 %v3724_v19, %v3722_v63 }
 0x818   :  { %v3752_v10 = vpop.f32.mrb[23].mxu0  ;;  %vm1764_vm8 = vcmp.ge.f32.partialorder %v1732_v1, 0.0  ;;  %v1796_v11 = vmul.f32 0.01, %v1732_v1  ;;  %v1733_v12 = vadd.f32 %v3736_v5, %v3701_v55  ;;  %vm1766_vm9 = vcmp.ge.f32.partialorder %v1734_v2, 0.0 }
 0x819   :  { %v1798_v13 = vmul.f32 0.01, %v1734_v2  ;;  %v1735_v14 = vadd.f32 %v3736_v5, %v3704_v59  ;;  %v1749_v17 = vadd.f32 %v3736_v5, %v3707_v60  ;;  %v1812_v30 = vmul.f32 0.01, %v1748_v3 }
 0x81a   :  { %v1828_v15 = vsel %vm1764_vm8, %v1732_v1, %v1796_v11  ;;  %vm1765_vm10 = vcmp.ge.f32.partialorder %v1733_v12, 0.0  ;;  %v1797_v16 = vmul.f32 0.01, %v1733_v12  ;;  %vm1780_vm12 = vcmp.ge.f32.partialorder %v1748_v3, 0.0 }
 0x81b   :  { %v1860_v21 = vmul.f32 %v1828_v15, %v3698_v53  ;;  %vm1767_vm11 = vcmp.ge.f32.partialorder %v1735_v14, 0.0  ;;  %v1799_v22 = vmul.f32 0.01, %v1735_v14  ;;  %v1830_v29 = vsel %vm1766_vm9, %v1734_v2, %v1798_v13 }
 0x81c   :  { %v1829_v28 = vsel %vm1765_vm10, %v1733_v12, %v1797_v16  ;;  %v1813_v33 = vmul.f32 0.01, %v1749_v17  ;;  %v1751_v34 = vadd.f32 %v3736_v5, %v3710_v61  ;;  %v1862_v35 = vmul.f32 %v1830_v29, %v3698_v53 }
 0x81d   :  { %1892 = vadd.xlane.f32.xlu0 %v1860_v21  ;;  %v1861_v31 = vmul.f32 %v1829_v28, %v3698_v53  ;;  %v1831_v32 = vsel %vm1767_vm11, %v1735_v14, %v1799_v22  ;;  %vm1781_vm13 = vcmp.ge.f32.partialorder %v1749_v17, 0.0  ;;  %v1737_v36 = vadd.f32 %v3736_v5, %v3713_v62 }
 0x81e   :  { %v1844_v40 = vsel %vm1780_vm12, %v1748_v3, %v1812_v30  ;;  %v1814_v41 = vmul.f32 0.01, %v1750_v4  ;;  %v1863_v43 = vmul.f32 %v1831_v32, %v3698_v53  ;;  %vm1782_vm14 = vcmp.ge.f32.partialorder %v1750_v4, 0.0 }
 0x81f   :  { %1894 = vadd.xlane.f32.xlu1 %v1861_v31  ;;  %v1845_v44 = vsel %vm1781_vm13, %v1749_v17, %v1813_v33  ;;  %v1815_v45 = vmul.f32 0.01, %v1751_v34  ;;  %v1800_v46 = vmul.f32 0.01, %v1736_v6  ;;  %v1876_v47 = vmul.f32 %v1844_v40, %v3698_v53 }
 0x820   :  { %vm1783_vm15 = vcmp.ge.f32.partialorder %v1751_v34, 0.0  ;;  %vm1768_vm1 = vcmp.ge.f32.partialorder %v1736_v6, 0.0  ;;  %v1753_v48 = vadd.f32 %v3736_v5, %v3719_v26  ;;  %v1846_v51 = vsel %vm1782_vm14, %v1750_v4, %v1814_v41 }
 0x821   :  { %1896 = vadd.xlane.f32.xlu0 %v1862_v35  ;;  %v1739_v52 = vadd.f32 %v3736_v5, %v3716_v58  ;;  %v1372_v1 = vrot.slane %v1356_v39, %v3685_v38  ;;  %v1877_v2 = vmul.f32 %v1845_v44, %v3698_v53  ;;  %v1847_v3 = vsel %vm1783_vm15, %v1751_v34, %v1815_v45 }
 0x822   :  { %v1832_v11 = vsel %vm1768_vm1, %v1736_v6, %v1800_v46  ;;  %v1801_v12 = vmul.f32 0.01, %v1737_v36  ;;  %v1878_v13 = vmul.f32 %v1846_v51, %v3698_v53  ;;  %vm1769_vm2 = vcmp.ge.f32.partialorder %v1737_v36, 0.0 }
 0x823   :  { %1898 = vadd.xlane.f32.xlu1 %v1863_v43  ;;  %v1755_v4 = vadd.f32 %v3736_v5, %v3722_v63  ;;  %v3789_v14 = vadd.f32 %v3724_v19, %v3780_v54  ;;  %v3792_v15 = vrot.slane %v1337_v49, %v3612_v25  ;;  %v3795_v16 = vrot.slane %v1358_v50, %v3685_v38 }
 0x824   :  { %v1816_v6 = vmul.f32 0.01, %v3742_v7  ;;  %v3800_v17 = vadd.f32 %v3736_v5, %v3780_v54  ;;  %v3803_v18 = vrot.slane %v1372_v1, %v3612_v25  ;;  %v1879_v21 = vmul.f32 %v1847_v3, %v3698_v53 }
 0x825   :  { %1924 = vadd.xlane.f32.xlu0 %v1876_v47  ;;  %v1864_v22 = vmul.f32 %v1832_v11, %v3698_v53  ;;  %vm1784_vm3 = vcmp.ge.f32.partialorder %v3742_v7, 0.0  ;;  %v1833_v27 = vsel %vm1769_vm2, %v1737_v36, %v1801_v12  ;;  %v1817_v28 = vmul.f32 0.01, %v1753_v48 }
 0x826   :  { %vm1770_vm4 = vcmp.ge.f32.partialorder %v3746_v8, 0.0  ;;  %v1802_v38 = vmul.f32 0.01, %v3746_v8  ;;  %vm1785_vm5 = vcmp.ge.f32.partialorder %v1753_v48, 0.0  ;;  %v1756_v29 = vadd.f32 %v3724_v19, %v3803_v18 }
 0x827   :  { %1926 = vadd.xlane.f32.xlu1 %v1877_v2  ;;  %v3814_v30 = vadd.f32 %v3736_v5, %v3803_v18  ;;  %v3818_v31 = vadd.f32 %v3724_v19, %v3792_v15  ;;  %v1339_v32 = vcombine.high %v1323_v42, %v1323_v42  ;;  %v1341_v33 = vcombine.high %v1337_v49, %v1337_v49 }
 0x828   :  { %v1848_v34 = vsel %vm1784_vm3, %v3742_v7, %v1816_v6  ;;  %v3823_v35 = vadd.f32 %v3736_v5, %v3792_v15  ;;  %v1388_v36 = vcombine.high %v1372_v1, %v1372_v1  ;;  %v3827_v37 = vrot.slane %v3795_v16, %v3612_v25 }
 0x829   :  { %1928 = vadd.xlane.f32.xlu0 %v1878_v13  ;;  %v1865_v39 = vmul.f32 %v1833_v27, %v3698_v53  ;;  %v1849_v40 = vsel %vm1785_vm5, %v1753_v48, %v1817_v28  ;;  %v1834_v41 = vsel %vm1770_vm4, %v3746_v8, %v1802_v38  ;;  %v1803_v42 = vmul.f32 0.01, %v1739_v52 }
 0x82a   :  { %v1880_v7 = vmul.f32 %v1848_v34, %v3698_v53  ;;  %vm1771_vm7 = vcmp.ge.f32.partialorder %v1739_v52, 0.0  ;;  %v3836_v43 = vadd.f32 %v3724_v19, %v3827_v37  ;;  %v3839_v44 = vrot.slane %v1339_v32, %v3612_v25 }
 0x82b   :  { %1930 = vadd.xlane.f32.xlu1 %v1879_v21  ;;  %v3842_v45 = vrot.slane %v1341_v33, %v3612_v25  ;;  %v1818_v46 = vmul.f32 0.01, %v3750_v9  ;;  %v3847_v8 = vadd.f32 %v3736_v5, %v3827_v37  ;;  %v3850_v47 = vrot.slane %v1388_v36, %v3612_v25 }
 0x82c   :  { %v1881_v48 = vmul.f32 %v1849_v40, %v3698_v53  ;;  %v1866_v49 = vmul.f32 %v1834_v41, %v3698_v53  ;;  %vm1786_vm8 = vcmp.ge.f32.partialorder %v3750_v9, 0.0  ;;  %v1835_v50 = vsel %vm1771_vm7, %v1739_v52, %v1803_v42 }
 0x82d   :  { %1900 = vadd.xlane.f32.xlu0 %v1864_v22  ;;  %vm1787_vm9 = vcmp.ge.f32.partialorder %v1755_v4, 0.0  ;;  %v1819_v51 = vmul.f32 0.01, %v1755_v4  ;;  %v1804_v1 = vmul.f32 0.01, %v3789_v14  ;;  %v3858_v2 = vadd.f32 %v3724_v19, %v3839_v44 }
 0x82e   :  { %v3862_v3 = vadd.f32 %v3736_v5, %v3839_v44  ;;  %v3866_v11 = vadd.f32 %v3724_v19, %v3850_v47  ;;  %v3870_v52 = vadd.f32 %v3736_v5, %v3850_v47  ;;  %v1850_v12 = vsel %vm1786_vm8, %v3750_v9, %v1818_v46 }
 0x82f   :  { %1902 = vadd.xlane.f32.xlu1 %v1865_v39  ;;  %vm1772_vm10 = vcmp.ge.f32.partialorder %v3789_v14, 0.0  ;;  %v3876_v13 = vadd.f32 %v3724_v19, %v3842_v45  ;;  %v3880_v6 = vadd.f32 %v3736_v5, %v3842_v45  ;;  %v1867_v21 = vmul.f32 %v1835_v50, %v3698_v53 }
 0x830   :  { %v1851_v22 = vsel %vm1787_vm9, %v1755_v4, %v1819_v51  ;;  %v1805_v27 = vmul.f32 0.01, %v3800_v17  ;;  %v1882_v28 = vmul.f32 %v1850_v12, %v3698_v53  ;;  %v1836_v9 = vsel %vm1772_vm10, %v3789_v14, %v1804_v1 }
 0x831   :  { %1932 = vadd.xlane.f32.xlu0 %v1880_v7  ;;  %vm1773_vm11 = vcmp.ge.f32.partialorder %v3800_v17, 0.0  ;;  %v1820_v38 = vmul.f32 0.01, %v1756_v29  ;;  %v1883_v32 = vmul.f32 %v1851_v22, %v3698_v53  ;;  %vm1788_vm12 = vcmp.ge.f32.partialorder %v1756_v29, 0.0 }
 0x832   :  { %v1868_v33 = vmul.f32 %v1836_v9, %v3698_v53  ;;  %v1837_v34 = vsel %vm1773_vm11, %v3800_v17, %v1805_v27  ;;  %v1821_v4 = vmul.f32 0.01, %v3814_v30  ;;  %v3893_v36 = vadd.f32 %v3701_v55, %v3726_v20 }
 0x833   :  { %1934 = vadd.xlane.f32.xlu1 %v1881_v48  ;;  %vm1789_vm13 = vcmp.ge.f32.partialorder %v3814_v30, 0.0  ;;  %v3898_v14 = vadd.f32 %v3701_v55, %v3752_v10  ;;  %v3902_v39 = vadd.f32 %v3704_v59, %v3726_v20  ;;  %v3906_v17 = vadd.f32 %v3704_v59, %v3752_v10 }
 0x834   :  { %v1852_v40 = vsel %vm1788_vm12, %v1756_v29, %v1820_v38  ;;  %v1806_v41 = vmul.f32 0.01, %v3818_v31  ;;  %v3911_v42 = vadd.f32 %v3707_v60, %v3726_v20  ;;  %v1869_v7 = vmul.f32 %v1837_v34, %v3698_v53 }
 0x835   :  { %1904 = vadd.xlane.f32.xlu0 %v1866_v49  ;;  %vm1774_vm14 = vcmp.ge.f32.partialorder %v3818_v31, 0.0  ;;  %v1853_v55 = vsel %vm1789_vm13, %v3814_v30, %v1821_v4  ;;  %v1807_v46 = vmul.f32 0.01, %v3823_v35  ;;  %v1884_v59 = vmul.f32 %v1852_v40, %v3698_v53 }
 0x836   :  { %vm1775_vm15 = vcmp.ge.f32.partialorder %v3823_v35, 0.0  ;;  %v1838_v29 = vsel %vm1774_vm14, %v3818_v31, %v1806_v41  ;;  %v1822_v48 = vmul.f32 0.01, %v3836_v43  ;;  %v3923_v49 = vadd.f32 %v3707_v60, %v3752_v10 }
 0x837   :  { %1906 = vadd.xlane.f32.xlu1 %v1867_v21  ;;  %v1885_v50 = vmul.f32 %v1853_v55, %v3698_v53  ;;  %vm1790_vm1 = vcmp.ge.f32.partialorder %v3836_v43, 0.0  ;;  %v3929_v30 = vadd.f32 %v3710_v61, %v3726_v20  ;;  %v1839_v51 = vsel %vm1775_vm15, %v3823_v35, %v1807_v46 }
 0x838   :  { %v1823_v1 = vmul.f32 0.01, %v3847_v8  ;;  %v3935_v31 = vadd.f32 %v3710_v61, %v3752_v10  ;;  %v1870_v60 = vmul.f32 %v1838_v29, %v3698_v53  ;;  %vm1791_vm2 = vcmp.ge.f32.partialorder %v3847_v8, 0.0 }
 0x839   :  { %1936 = vadd.xlane.f32.xlu0 %v1882_v28  ;;  %v3941_v12 = vadd.f32 %v3713_v62, %v3726_v20  ;;  %v3945_v21 = vadd.f32 %v3713_v62, %v3752_v10  ;;  %v1854_v35 = vsel %vm1790_vm1, %v3836_v43, %v1822_v48  ;;  %v1808_v22 = vmul.f32 0.01, %v3858_v2 }
 0x83a   :  { %v3951_v61 = vadd.f32 %v3719_v26, %v3726_v20  ;;  %v1871_v27 = vmul.f32 %v1839_v51, %v3698_v53  ;;  %vm1776_vm3 = vcmp.ge.f32.partialorder %v3858_v2, 0.0  ;;  %v1855_v28 = vsel %vm1791_vm2, %v3847_v8, %v1823_v1 }
 0x83b   :  { %1938 = vadd.xlane.f32.xlu1 %v1883_v32  ;;  %v1809_v9 = vmul.f32 0.01, %v3862_v3  ;;  %v1886_v62 = vmul.f32 %v1854_v35, %v3698_v53  ;;  %vm1777_vm4 = vcmp.ge.f32.partialorder %v3862_v3, 0.0  ;;  %v1840_v43 = vsel %vm1776_vm3, %v3858_v2, %v1808_v22 }
 0x83c   :  { %v1824_v38 = vmul.f32 0.01, %v3866_v11  ;;  %v3963_v32 = vadd.f32 %v3719_v26, %v3752_v10  ;;  %v1887_v8 = vmul.f32 %v1855_v28, %v3698_v53  ;;  %vm1792_vm5 = vcmp.ge.f32.partialorder %v3866_v11, 0.0 }
 0x83d   :  { %1908 = vadd.xlane.f32.xlu0 %v1868_v33  ;;  %v3967_v33 = vadd.f32 %v3716_v58, %v3726_v20  ;;  %v3973_v34 = vadd.f32 %v3716_v58, %v3752_v10  ;;  %v3977_v2 = vadd.f32 %v3722_v63, %v3726_v20  ;;  %v1841_v26 = vsel %vm1777_vm4, %v3862_v3, %v1809_v9 }
 0x83e   :  { %v1825_v4 = vmul.f32 0.01, %v3870_v52  ;;  %v1872_v40 = vmul.f32 %v1840_v43, %v3698_v53  ;;  %vm1793_vm7 = vcmp.ge.f32.partialorder %v3870_v52, 0.0  ;;  %v1856_v41 = vsel %vm1792_vm5, %v3866_v11, %v1824_v38 }
 0x83f   :  { %1910 = vadd.xlane.f32.xlu1 %v1869_v7  ;;  %v1810_v7 = vmul.f32 0.01, %v3876_v13  ;;  %v3987_v58 = vadd.f32 %v3722_v63, %v3752_v10  ;;  %v3991_v55 = vadd.f32 %v3780_v54, %v3726_v20  ;;  %v1873_v3 = vmul.f32 %v1841_v26, %v3698_v53 }
 0x840   :  { %vm1778_vm8 = vcmp.ge.f32.partialorder %v3876_v13, 0.0  ;;  %v3997_v46 = vadd.f32 %v3780_v54, %v3752_v10  ;;  %v1857_v11 = vsel %vm1793_vm7, %v3870_v52, %v1825_v4  ;;  %v1888_v63 = vmul.f32 %v1856_v41, %v3698_v53 }
 0x841   :  { %1940 = vadd.xlane.f32.xlu0 %v1884_v59  ;;  %v1811_v59 = vmul.f32 0.01, %v3880_v6  ;;  %vm1779_vm9 = vcmp.ge.f32.partialorder %v3880_v6, 0.0  ;;  %v1842_v29 = vsel %vm1778_vm8, %v3876_v13, %v1810_v7  ;;  %v1535_v48 = vmul.f32 0.01, %v3893_v36 }
 0x842   :  { %v4011_v54 = vadd.f32 %v3803_v18, %v3752_v10  ;;  %v1889_v52 = vmul.f32 %v1857_v11, %v3698_v53  ;;  %vm1503_vm10 = vcmp.ge.f32.partialorder %v3893_v36, 0.0  ;;  %v4017_v51 = vadd.f32 %v3792_v15, %v3726_v20 }
 0x843   :  { %1942 = vadd.xlane.f32.xlu1 %v1885_v50  ;;  %v4007_v50 = vadd.f32 %v3803_v18, %v3726_v20  ;;  %v4021_v13 = vadd.f32 %v3792_v15, %v3752_v10  ;;  %v1843_v1 = vsel %vm1779_vm9, %v3880_v6, %v1811_v59  ;;  %v1874_v18 = vmul.f32 %v1842_v29, %v3698_v53 }
 0x844   :  { %vm1504_vm11 = vcmp.ge.f32.partialorder %v3898_v14, 0.0  ;;  %v1567_v35 = vsel %vm1503_vm10, %v3893_v36, %v1535_v48  ;;  %v1537_v22 = vmul.f32 0.01, %v3902_v39  ;;  %vm1505_vm12 = vcmp.ge.f32.partialorder %v3902_v39, 0.0 }
 0x845   :  { %1912 = vadd.xlane.f32.xlu0 %v1870_v60  ;;  %v1536_v60 = vmul.f32 0.01, %v3898_v14  ;;  %v4033_v15 = vadd.f32 %v3827_v37, %v3726_v20  ;;  %v4037_v6 = vadd.f32 %v3827_v37, %v3752_v10  ;;  %v1538_v9 = vmul.f32 0.01, %v3906_v17 }
 0x846   :  { %v1390_v36 = vcombine.high %v3795_v16, %v3795_v16  ;;  %vm1506_vm13 = vcmp.ge.f32.partialorder %v3906_v17, 0.0  ;;  %vm1519_vm14 = vcmp.ge.f32.partialorder %v3911_v42, 0.0  ;;  %v1569_v43 = vsel %vm1505_vm12, %v3902_v39, %v1537_v22 }
 0x847   :  { %1914 = vadd.xlane.f32.xlu1 %v1871_v27  ;;  %v1875_v27 = vmul.f32 %v1843_v1, %v3698_v53  ;;  %v1568_v28 = vsel %vm1504_vm11, %v3898_v14, %v1536_v60  ;;  %v1551_v38 = vmul.f32 0.01, %v3911_v42  ;;  %v4050_v37 = vadd.f32 %v3839_v44, %v3726_v20 }
 0x848   :  { %v4054_v14 = vadd.f32 %v3839_v44, %v3752_v10  ;;  %v1604_v16 = vmul.f32 %v3698_v53, %v1568_v28  ;;  %v4063_v39 = vadd.f32 %v3850_v47, %v3752_v10  ;;  %v4067_v26 = vadd.f32 %v3842_v45, %v3726_v20 }
 0x849   :  { %1944 = vadd.xlane.f32.xlu0 %v1886_v62  ;;  %v1603_v62 = vmul.f32 %v3698_v53, %v1567_v35  ;;  %v1570_v4 = vsel %vm1506_vm13, %v3906_v17, %v1538_v9  ;;  %v1552_v44 = vmul.f32 0.01, %v3923_v49  ;;  %vm1520_vm15 = vcmp.ge.f32.partialorder %v3923_v49, 0.0 }
 0x84a   :  { %v1583_v41 = vsel %vm1519_vm14, %v3911_v42, %v1551_v38  ;;  %v1553_v7 = vmul.f32 0.01, %v3929_v30  ;;  %vm1521_vm1 = vcmp.ge.f32.partialorder %v3929_v30, 0.0  ;;  %v1554_v11 = vmul.f32 0.01, %v3935_v31 }
 0x84b   :  { %1946 = vadd.xlane.f32.xlu1 %v1887_v8  ;;  %v4059_v8 = vadd.f32 %v3850_v47, %v3726_v20  ;;  %v1454_v47 = vrot.slane %v1390_v36, %v3612_v25  ;;  %v1584_v17 = vsel %vm1520_vm15, %v3923_v49, %v1552_v44  ;;  %v4082_v59 = vadd.f32 %v3842_v45, %v3752_v10 }
 0x84c   :  { %v1619_v42 = vmul.f32 %v3698_v53, %v1583_v41  ;;  %vm1522_vm2 = vcmp.ge.f32.partialorder %v3935_v31, 0.0  ;;  %v1539_v29 = vmul.f32 0.01, %v3941_v12  ;;  %v1620_v48 = vmul.f32 %v3698_v53, %v1584_v17 }
 0x84d   :  { %1916 = vadd.xlane.f32.xlu0 %v1872_v40  ;;  %v1605_v40 = vmul.f32 %v3698_v53, %v1569_v43  ;;  %v4087_v25 = vadd.f32 %v1454_v47, %v3726_v20  ;;  %v4092_v49 = vadd.f32 %v1454_v47, %v3752_v10  ;;  %vm1507_vm3 = vcmp.ge.f32.partialorder %v3941_v12, 0.0 }
 0x84e   :  { %v4097_v45 = vadd.f32 %v3724_v19, %v1454_v47  ;;  %v1586_v20 = vsel %vm1522_vm2, %v3935_v31, %v1554_v11  ;;  %vm1508_vm4 = vcmp.ge.f32.partialorder %v3945_v21, 0.0  ;;  %v1571_v10 = vsel %vm1507_vm3, %v3941_v12, %v1539_v29 }
 0x84f   :  { %1918 = vadd.xlane.f32.xlu1 %v1873_v3  ;;  %v1606_v3 = vmul.f32 %v3698_v53, %v1570_v4  ;;  %v1555_v60 = vmul.f32 0.01, %v3951_v61  ;;  %v1622_v19 = vmul.f32 %v3698_v53, %v1586_v20  ;;  %vm1523_vm5 = vcmp.ge.f32.partialorder %v3951_v61, 0.0 }
 0x850   :  { %v1556_v31 = vmul.f32 0.01, %v3963_v32  ;;  %vm1524_vm7 = vcmp.ge.f32.partialorder %v3963_v32, 0.0  ;;  %v1541_v12 = vmul.f32 0.01, %v3967_v33  ;;  %vm1509_vm8 = vcmp.ge.f32.partialorder %v3967_v33, 0.0 }
 0x851   :  { %1948 = vadd.xlane.f32.xlu0 %v1888_v63  ;;  %v1585_v63 = vsel %vm1521_vm1, %v3929_v30, %v1553_v7  ;;  %v1540_v30 = vmul.f32 0.01, %v3945_v21  ;;  %v1587_v35 = vsel %vm1523_vm5, %v3951_v61, %v1555_v60  ;;  %vm1510_vm9 = vcmp.ge.f32.partialorder %v3973_v34, 0.0 }
 0x852   :  { %v1621_v1 = vmul.f32 %v3698_v53, %v1585_v63  ;;  %v1623_v28 = vmul.f32 %v3698_v53, %v1587_v35  ;;  %v1573_v9 = vsel %vm1509_vm8, %v3967_v33, %v1541_v12  ;;  %v1557_v61 = vmul.f32 0.01, %v3977_v2 }
 0x853   :  { %1950 = vadd.xlane.f32.xlu1 %v1889_v52  ;;  %v4100_v52 = vadd.f32 %v3736_v5, %v1454_v47  ;;  %v1572_v5 = vsel %vm1508_vm4, %v3945_v21, %v1540_v30  ;;  %v1542_v21 = vmul.f32 0.01, %v3973_v34  ;;  %vm1525_vm10 = vcmp.ge.f32.partialorder %v3977_v2, 0.0 }
 0x854   :  { %v1608_v22 = vmul.f32 %v3698_v53, %v1572_v5  ;;  %v1609_v43 = vmul.f32 %v3698_v53, %v1573_v9  ;;  %vm1526_vm11 = vcmp.ge.f32.partialorder %v3987_v58, 0.0  ;;  %v1589_v38 = vsel %vm1525_vm10, %v3977_v2, %v1557_v61 }
 0x855   :  { %1920 = vadd.xlane.f32.xlu0 %v1874_v18  ;;  %v1607_v18 = vmul.f32 %v3698_v53, %v1571_v10  ;;  %v1543_v33 = vmul.f32 0.01, %v3991_v55  ;;  %vm1511_vm12 = vcmp.ge.f32.partialorder %v3991_v55, 0.0  ;;  %v1625_v44 = vmul.f32 %v3698_v53, %v1589_v38 }
 0x856   :  { %vm1512_vm13 = vcmp.ge.f32.partialorder %v3997_v46, 0.0  ;;  %v1559_v2 = vmul.f32 0.01, %v4007_v50  ;;  %vm1527_vm14 = vcmp.ge.f32.partialorder %v4007_v50, 0.0  ;;  %vm1528_vm15 = vcmp.ge.f32.partialorder %v4011_v54, 0.0 }
 0x857   :  { %1922 = vadd.xlane.f32.xlu1 %v1875_v27  ;;  %v1588_v27 = vsel %vm1524_vm7, %v3963_v32, %v1556_v31  ;;  %v1558_v32 = vmul.f32 0.01, %v3987_v58  ;;  %vm1513_vm1 = vcmp.ge.f32.partialorder %v4017_v51, 0.0  ;;  %vm1514_vm2 = vcmp.ge.f32.partialorder %v4021_v13, 0.0 }
 0x858   :  { %v1624_v36 = vmul.f32 %v3698_v53, %v1588_v27  ;;  %vm1529_vm3 = vcmp.ge.f32.partialorder %v4033_v15, 0.0  ;;  %vm1530_vm4 = vcmp.ge.f32.partialorder %v4037_v6, 0.0  ;;  %vm1515_vm5 = vcmp.ge.f32.partialorder %v4050_v37, 0.0 }
 0x859   :  { %1635 = vadd.xlane.f32.xlu0 %v1603_v62  ;;  %v1574_v62 = vsel %vm1510_vm9, %v3973_v34, %v1542_v21  ;;  %v1590_v4 = vsel %vm1526_vm11, %v3987_v58, %v1558_v32  ;;  %v1544_v34 = vmul.f32 0.01, %v3997_v46  ;;  %v1560_v58 = vmul.f32 0.01, %v4011_v54 }
 0x85a   :  { %v1626_v41 = vmul.f32 %v3698_v53, %v1590_v4  ;;  %vm1516_vm7 = vcmp.ge.f32.partialorder %v4054_v14, 0.0  ;;  %vm1531_vm8 = vcmp.ge.f32.partialorder %v4059_v8, 0.0  ;;  %vm1532_vm9 = vcmp.ge.f32.partialorder %v4063_v39, 0.0 }
 0x85b   :  { %1637 = vadd.xlane.f32.xlu1 %v1604_v16  ;;  %v1610_v16 = vmul.f32 %v3698_v53, %v1574_v62  ;;  %v1576_v7 = vsel %vm1512_vm13, %v3997_v46, %v1544_v34  ;;  %v1592_v11 = vsel %vm1528_vm15, %v4011_v54, %v1560_v58  ;;  %v1546_v46 = vmul.f32 0.01, %v4021_v13 }
 0x85c   :  { %v1612_v17 = vmul.f32 %v3698_v53, %v1576_v7  ;;  %v1628_v29 = vmul.f32 %v3698_v53, %v1592_v11  ;;  %v1562_v54 = vmul.f32 0.01, %v4037_v6  ;;  %vm1517_vm10 = vcmp.ge.f32.partialorder %v4067_v26, 0.0 }
 0x85d   :  { %1639 = vadd.xlane.f32.xlu0 %v1605_v40  ;;  %v1575_v40 = vsel %vm1511_vm12, %v3991_v55, %v1543_v33  ;;  %v1545_v55 = vmul.f32 0.01, %v4017_v51  ;;  %vm1518_vm11 = vcmp.ge.f32.partialorder %v4082_v59, 0.0  ;;  %vm1533_vm12 = vcmp.ge.f32.partialorder %v4087_v25, 0.0 }
 0x85e   :  { %v1611_v47 = vmul.f32 %v3698_v53, %v1575_v40  ;;  %v1594_v10 = vsel %vm1530_vm4, %v4037_v6, %v1562_v54  ;;  %v1564_v6 = vmul.f32 0.01, %v4063_v39  ;;  %vm1534_vm13 = vcmp.ge.f32.partialorder %v4092_v49, 0.0 }
 0x85f   :  { %1641 = vadd.xlane.f32.xlu1 %v1606_v3  ;;  %v1591_v3 = vsel %vm1527_vm14, %v4007_v50, %v1559_v2  ;;  %v1577_v63 = vsel %vm1513_vm1, %v4017_v51, %v1545_v55  ;;  %v1561_v50 = vmul.f32 0.01, %v4033_v15  ;;  %v1547_v51 = vmul.f32 0.01, %v4050_v37 }
 0x860   :  { %v1613_v20 = vmul.f32 %v3698_v53, %v1577_v63  ;;  %v1630_v5 = vmul.f32 %v3698_v53, %v1594_v10  ;;  %vm1794_vm14 = vcmp.ge.f32.partialorder %v4097_v45, 0.0  ;;  %vm1795_vm15 = vcmp.ge.f32.partialorder %v4100_v52, 0.0 }
 0x861   :  { %1667 = vadd.xlane.f32.xlu0 %v1619_v42  ;;  %v1627_v42 = vmul.f32 %v3698_v53, %v1591_v3  ;;  %v1593_v30 = vsel %vm1529_vm3, %v4033_v15, %v1561_v50  ;;  %v1563_v15 = vmul.f32 0.01, %v4059_v8  ;;  %v4208_v4 = vand.u32 127, %v274_v23 }
 0x862   :  { %v1629_v60 = vmul.f32 %v3698_v53, %v1593_v30  ;;  %vm2233_vm1 = vcmask 261312   ;;  %vm2170_vm3 = vcmask 1042434   ;;  %vm2172_vm4 = vcmask 1043459  }
 0x863   :  { %1669 = vadd.xlane.f32.xlu1 %v1620_v48  ;;  %v1578_v48 = vsel %vm1514_vm2, %v4021_v13, %v1546_v46  ;;  %v1548_v13 = vmul.f32 0.01, %v4054_v14  ;;  %v1595_v35 = vsel %vm1531_vm8, %v4059_v8, %v1563_v15  ;;  %v1565_v8 = vmul.f32 0.01, %v4087_v25 }
 0x864   :  { %v1631_v27 = vmul.f32 %v3698_v53, %v1595_v35  ;;  %v2223_v34 = vadd.s32 4294967280, %v4208_v4  ;;  %vm2168_vm2 = vcmask 1041409   ;;  %vm2178_vm8 = vcmask 1046534  }
 0x865   :  { %1671 = vadd.xlane.f32.xlu0 %v1621_v1  ;;  %v1614_v1 = vmul.f32 %v3698_v53, %v1578_v48  ;;  %v1580_v31 = vsel %vm1516_vm7, %v4054_v14, %v1548_v13  ;;  %v1550_v14 = vmul.f32 0.01, %v4082_v59  ;;  %vm2176_vm7 = vcmask 1045509  }
 0x866   :  { %v1616_v12 = vmul.f32 %v3698_v53, %v1580_v31  ;;  %v4218_v40 = vsub.s32 %v2223_v34, %v3609_v24 }
 0x867   :  { %1673 = vadd.xlane.f32.xlu1 %v1622_v19  ;;  %v1579_v19 = vsel %vm1515_vm5, %v4050_v37, %v1547_v51  ;;  %v1549_v37 = vmul.f32 0.01, %v4067_v26  ;;  %v1582_v9 = vsel %vm1518_vm11, %v4082_v59, %v1550_v14  ;;  %v1827_v59 = vmul.f32 0.01, %v4100_v52 }
 0x868   :  { %v1618_v62 = vmul.f32 %v3698_v53, %v1582_v9  ;;  %vm2174_vm5 = vcmask 1044484  }
 0x869   :  { %1643 = vadd.xlane.f32.xlu0 %v1607_v18  ;;  %v1615_v18 = vmul.f32 %v3698_v53, %v1579_v19  ;;  %v1581_v21 = vsel %vm1517_vm10, %v4067_v26, %v1549_v37  ;;  %v1826_v26 = vmul.f32 0.01, %v4097_v45  ;;  %v1859_v33 = vsel %vm1795_vm15, %v4100_v52, %v1827_v59 }
 0x86a   :  { %v1617_v61 = vmul.f32 %v3698_v53, %v1581_v21  ;;  %vm2031_vm10 = vcmask 130112  }
 0x86b   :  { %1645 = vadd.xlane.f32.xlu1 %v1608_v22  ;;  %v1596_v22 = vsel %vm1532_vm9, %v4063_v39, %v1564_v6  ;;  %v1566_v39 = vmul.f32 0.01, %v4092_v49  ;;  %v1858_v38 = vsel %vm1794_vm14, %v4097_v45, %v1826_v26  ;;  %v4215_v45 = vstv %s4518_s9  ;;  %s3357_s9 = smov [#allocation19]  }
 0x86c   :  { %vm2180_vm9 = vcmask 1047559   ;;  %s2589_s24 = sshll.u32 %s3357_s9, 4  ;;  %s2590_s24 = int_to_ptr.vmem [resolvable:$true] %s2589_s24 }
 0x86d   :  { %1675 = vadd.xlane.f32.xlu0 %v1623_v28  ;;  %v1632_v28 = vmul.f32 %v3698_v53, %v1596_v22  ;;  %v1598_v32 = vsel %vm1534_vm13, %v4092_v49, %v1566_v39  ;;  %v1891_v49 = vmul.f32 %v1859_v33, %v3698_v53  ;;  %s3283_s15 = scalar_lea.vmem %s2590_s24, 512  ;;  %p3288_p3 = scmp.lt.s32.totalorder %s2590_s24, %s2590_s24 }
 0x86e   :  { %p3284_p2 = scmp.ne.s32.totalorder %s2590_s24, %s3283_s15  ;;  %p3289_p4 = scmp.lt.s32.totalorder %s3283_s15, %s3283_s15 }
 0x86f   :  { %1677 = vadd.xlane.f32.xlu1 %v1624_v36  ;;  %v1597_v36 = vsel %vm1533_vm12, %v4087_v25, %v1565_v8  ;;  %v1634_v25 = vmul.f32 %v3698_v53, %v1598_v32  ;;  %vm2396_vm12 = vcmask 261120  }
 0x870   :  { %p3290_p5 = por %p3289_p4, %p3288_p3 }
 0x871   :  { %1647 = vadd.xlane.f32.xlu0 %v1609_v43  ;;  %v1633_v43 = vmul.f32 %v3698_v53, %v1597_v36 }
 0x872   :  { %p3291_p6 = pnand %p3290_p5, %p3284_p2 }
 0x873   :  { %1649 = vadd.xlane.f32.xlu1 %v1610_v16  ;;  %v1890_v16 = vmul.f32 %v1858_v38, %v3698_v53 }
 0x875   :  { %1679 = vadd.xlane.f32.xlu0 %v1625_v44  ;;  %v2228_v44 = vadd.s32 4294967272, %v4208_v4 }
 0x877   :  { %1681 = vadd.xlane.f32.xlu1 %v1626_v41  ;;  %v4222_v53 = vsub.s32 %v2228_v44, %v3609_v24 }
 0x879   :  { %1651 = vadd.xlane.f32.xlu0 %v1611_v47 }
 0x87b   :  { %1653 = vadd.xlane.f32.xlu1 %v1612_v17 }
 0x87d   :  { %1683 = vadd.xlane.f32.xlu0 %v1627_v42 }
 0x87f   :  { %1685 = vadd.xlane.f32.xlu1 %v1628_v29 }
 0x881   :  { %1655 = vadd.xlane.f32.xlu0 %v1613_v20 }
 0x883   :  { %1657 = vadd.xlane.f32.xlu1 %v1614_v1 }
 0x885   :  { %1687 = vadd.xlane.f32.xlu0 %v1629_v60 }
 0x887   :  { %1689 = vadd.xlane.f32.xlu1 %v1630_v5 }
 0x889   :  { %1659 = vadd.xlane.f32.xlu0 %v1615_v18 }
 0x88b   :  { %1661 = vadd.xlane.f32.xlu1 %v1616_v12 }
 0x88d   :  { %1691 = vadd.xlane.f32.xlu0 %v1631_v27 }
 0x88f   :  { %1693 = vadd.xlane.f32.xlu1 %v1632_v28 }
 0x891   :  { %1663 = vadd.xlane.f32.xlu0 %v1617_v61 }
 0x893   :  { %1665 = vadd.xlane.f32.xlu1 %v1618_v62 }
 0x895   :  { %1695 = vadd.xlane.f32.xlu0 %v1633_v43 }
 0x897   :  { %1697 = vadd.xlane.f32.xlu1 %v1634_v25 }
 0x899   :  { %1952 = vadd.xlane.f32.xlu0 %v1890_v16 }
 0x89b   :  { %1954 = vadd.xlane.f32.xlu1 %v1891_v49 }
 0x8aa   :  { %v1893_v52 = vpop.xlane.xlu0 %1892 }
 0x8ab   :  { %v1956_v2 = vadd.f32 %v1893_v52, %v4215_v45 }
 0x8ac   :  { %v1895_v23 = vpop.xlane.xlu1 %1894 }
 0x8ad   :  { %v1957_v41 = vadd.f32 %v1895_v23, %v4215_v45  ;;  %v2227_v58 = vrot.slane %v1956_v2, %v4218_v40 }
 0x8ae   :  { %v1897_v7 = vpop.xlane.xlu0 %1896 }
 0x8af   :  { %v2232_v47 = vrot.slane %v1957_v41, %v4222_v53  ;;  %v1958_v3 = vadd.f32 %v1897_v7, %v4215_v45 }
 0x8b0   :  { %v1899_v55 = vpop.xlane.xlu1 %1898 }
 0x8b1   :  { %v2234_v17 = vsel %vm2233_vm1, %v2232_v47, %v2227_v58  ;;  %v1959_v11 = vadd.f32 %v1899_v55, %v4215_v45  ;;  %v2238_v42 = vrot.slane %v1958_v3, %v4218_v40 }
 0x8b2   :  { %v1925_v46 = vpop.xlane.xlu0 %1924 }
 0x8b3   :  { %v2242_v63 = vrot.slane %v1959_v11, %v4222_v53  ;;  %v1972_v50 = vadd.f32 %v1925_v46, %v4215_v45 }
 0x8b4   :  { %v1927_v29 = vpop.xlane.xlu1 %1926 }
 0x8b5   :  { %v2243_v48 = vsel %vm2233_vm1, %v2242_v63, %v2238_v42  ;;  %v1973_v54 = vadd.f32 %v1927_v29, %v4215_v45  ;;  %v2301_v51 = vrot.slane %v1972_v50, %v4218_v40 }
 0x8b6   :  { %v2370_v20 = vsel %vm2168_vm2, %v2243_v48, %v2234_v17  ;;  %v1929_v30 = vpop.xlane.xlu0 %1928 }
 0x8b7   :  { %v2305_v1 = vrot.slane %v1973_v54, %v4222_v53  ;;  %v1974_v10 = vadd.f32 %v1929_v30, %v4215_v45 }
 0x8b8   :  { %v1931_v13 = vpop.xlane.xlu1 %1930 }
 0x8b9   :  { %v2306_v60 = vsel %vm2233_vm1, %v2305_v1, %v2301_v51  ;;  %v1975_v19 = vadd.f32 %v1931_v13, %v4215_v45  ;;  %v2310_v5 = vrot.slane %v1974_v10, %v4218_v40 }
 0x8ba   :  { %v1901_v15 = vpop.xlane.xlu0 %1900 }
 0x8bb   :  { %v2314_v31 = vrot.slane %v1975_v19, %v4222_v53  ;;  %v1960_v6 = vadd.f32 %v1901_v15, %v4215_v45 }
 0x8bc   :  { %v1903_v18 = vpop.xlane.xlu1 %1902 }
 0x8bd   :  { %v2315_v35 = vsel %vm2233_vm1, %v2314_v31, %v2310_v5  ;;  %v1961_v37 = vadd.f32 %v1903_v18, %v4215_v45  ;;  %v2247_v14 = vrot.slane %v1960_v6, %v4218_v40 }
 0x8be   :  { %v2377_v12 = vsel %vm2168_vm2, %v2315_v35, %v2306_v60  ;;  %v1933_v22 = vpop.xlane.xlu0 %1932 }
 0x8bf   :  { %v2251_v27 = vrot.slane %v1961_v37, %v4222_v53  ;;  %v1976_v21 = vadd.f32 %v1933_v22, %v4215_v45 }
 0x8c0   :  { %v1935_v8 = vpop.xlane.xlu1 %1934 }
 0x8c1   :  { %v2252_v28 = vsel %vm2233_vm1, %v2251_v27, %v2247_v14  ;;  %v1977_v9 = vadd.f32 %v1935_v8, %v4215_v45  ;;  %v2319_v36 = vrot.slane %v1976_v21, %v4218_v40 }
 0x8c2   :  { %v2371_v39 = vsel %vm2170_vm3, %v2252_v28, %v2370_v20  ;;  %v1905_v61 = vpop.xlane.xlu0 %1904 }
 0x8c3   :  { %v2323_v26 = vrot.slane %v1977_v9, %v4222_v53  ;;  %v1962_v62 = vadd.f32 %v1905_v61, %v4215_v45 }
 0x8c4   :  { %v1907_v32 = vpop.xlane.xlu1 %1906 }
 0x8c5   :  { %v2324_v59 = vsel %vm2233_vm1, %v2323_v26, %v2319_v36  ;;  %v1963_v43 = vadd.f32 %v1907_v32, %v4215_v45  ;;  %v2256_v33 = vrot.slane %v1962_v62, %v4218_v40 }
 0x8c6   :  { %v2378_v38 = vsel %vm2170_vm3, %v2324_v59, %v2377_v12  ;;  %v1937_v25 = vpop.xlane.xlu0 %1936 }
 0x8c7   :  { %v2260_v16 = vrot.slane %v1963_v43, %v4222_v53  ;;  %v1978_v49 = vadd.f32 %v1937_v25, %v4215_v45 }
 0x8c8   :  { %v1939_v34 = vpop.xlane.xlu1 %1938 }
 0x8c9   :  { %v2261_v44 = vsel %vm2233_vm1, %v2260_v16, %v2256_v33  ;;  %v1979_v52 = vadd.f32 %v1939_v34, %v4215_v45  ;;  %v2328_v41 = vrot.slane %v1978_v49, %v4218_v40 }
 0x8ca   :  { %v2372_v2 = vsel %vm2172_vm4, %v2261_v44, %v2371_v39  ;;  %v1909_v23 = vpop.xlane.xlu0 %1908 }
 0x8cb   :  { %v2332_v7 = vrot.slane %v1979_v52, %v4222_v53  ;;  %v1964_v58 = vadd.f32 %v1909_v23, %v4215_v45 }
 0x8cc   :  { %v1911_v47 = vpop.xlane.xlu1 %1910 }
 0x8cd   :  { %v2333_v3 = vsel %vm2233_vm1, %v2332_v7, %v2328_v41  ;;  %v1965_v55 = vadd.f32 %v1911_v47, %v4215_v45  ;;  %v2265_v46 = vrot.slane %v1964_v58, %v4218_v40 }
 0x8ce   :  { %v2379_v17 = vsel %vm2172_vm4, %v2333_v3, %v2378_v38  ;;  %v1941_v11 = vpop.xlane.xlu0 %1940 }
 0x8cf   :  { %v2269_v42 = vrot.slane %v1965_v55, %v4222_v53  ;;  %v1980_v63 = vadd.f32 %v1941_v11, %v4215_v45 }
 0x8d0   :  { %v1943_v50 = vpop.xlane.xlu1 %1942 }
 0x8d1   :  { %v2270_v29 = vsel %vm2233_vm1, %v2269_v42, %v2265_v46  ;;  %v1981_v48 = vadd.f32 %v1943_v50, %v4215_v45  ;;  %v2337_v30 = vrot.slane %v1980_v63, %v4218_v40 }
 0x8d2   :  { %v2373_v54 = vsel %vm2174_vm5, %v2270_v29, %v2372_v2  ;;  %v1913_v20 = vpop.xlane.xlu0 %1912 }
 0x8d3   :  { %v2341_v51 = vrot.slane %v1981_v48, %v4222_v53  ;;  %v1966_v1 = vadd.f32 %v1913_v20, %v4215_v45 }
 0x8d4   :  { %v1915_v10 = vpop.xlane.xlu1 %1914 }
 0x8d5   :  { %v2342_v13 = vsel %vm2233_vm1, %v2341_v51, %v2337_v30  ;;  %v1967_v60 = vadd.f32 %v1915_v10, %v4215_v45  ;;  %v2274_v5 = vrot.slane %v1966_v1, %v4218_v40  ;;  %v2026_v51 = vadd.s32 4294967288, %v4208_v4 }
 0x8d6   :  { %v2380_v19 = vsel %vm2174_vm5, %v2342_v13, %v2379_v17  ;;  %v1945_v15 = vpop.xlane.xlu0 %1944 }
 0x8d7   :  { %v2278_v31 = vrot.slane %v1967_v60, %v4222_v53  ;;  %v1982_v6 = vadd.f32 %v1945_v15, %v4215_v45 }
 0x8d8   :  { %v1947_v18 = vpop.xlane.xlu1 %1946 }
 0x8d9   :  { %v2279_v35 = vsel %vm2233_vm1, %v2278_v31, %v2274_v5  ;;  %v1983_v37 = vadd.f32 %v1947_v18, %v4215_v45  ;;  %v2346_v14 = vrot.slane %v1982_v6, %v4218_v40  ;;  %v4327_v18 = vsub.s32 %v4208_v4, %v3609_v24 }
 0x8da   :  { %v1917_v12 = vpop.xlane.xlu0 %1916  ;;  %v2374_v22 = vsel %vm2176_vm7, %v2279_v35, %v2373_v54 }
 0x8db   :  { %v2350_v27 = vrot.slane %v1983_v37, %v4222_v53  ;;  %v1968_v21 = vadd.f32 %v1917_v12, %v4215_v45  ;;  %v4331_v12 = vld [vmem:[#allocation12] sm:$0xff]  }
 0x8dc   :  { %v1919_v8 = vpop.xlane.xlu1 %1918 }
 0x8dd   :  { %v2351_v28 = vsel %vm2233_vm1, %v2350_v27, %v2346_v14  ;;  %v1969_v9 = vadd.f32 %v1919_v8, %v4215_v45  ;;  %v2283_v36 = vrot.slane %v1968_v21, %v4218_v40 }
 0x8de   :  { %v1949_v39 = vpop.xlane.xlu0 %1948  ;;  %v2381_v61 = vsel %vm2176_vm7, %v2351_v28, %v2380_v19  ;;  %v4320_v19 = vsub.s32 %v2026_v51, %v3609_v24 }
 0x8df   :  { %v2287_v26 = vrot.slane %v1969_v9, %v4222_v53  ;;  %v1984_v62 = vadd.f32 %v1949_v39, %v4215_v45 }
 0x8e0   :  { %v1951_v32 = vpop.xlane.xlu1 %1950 }
 0x8e1   :  { %v2288_v59 = vsel %vm2233_vm1, %v2287_v26, %v2283_v36  ;;  %v1985_v43 = vadd.f32 %v1951_v32, %v4215_v45  ;;  %v2355_v33 = vrot.slane %v1984_v62, %v4218_v40  ;;  %v2698_v32 = vunpack.c.h.bf16 %v4331_v12 }
 0x8e2   :  { %v1921_v38 = vpop.xlane.xlu0 %1920  ;;  %v2375_v25 = vsel %vm2178_vm8, %v2288_v59, %v2374_v22 }
 0x8e3   :  { %v2359_v16 = vrot.slane %v1985_v43, %v4222_v53  ;;  %v1970_v10 = vadd.f32 %v1921_v38, %v4215_v45  ;;  %vm2393_vm13 = vcmp.gt.f32.partialorder %v2698_v32, 0.0 }
 0x8e4   :  { %v1923_v49 = vpop.xlane.xlu1 %1922 }
 0x8e5   :  { %v2360_v34 = vsel %vm2233_vm1, %v2359_v16, %v2355_v33  ;;  %v1971_v30 = vadd.f32 %v1923_v49, %v4215_v45  ;;  %v2292_v6 = vrot.slane %v1970_v10, %v4218_v40 }
 0x8e6   :  { %v1636_v44 = vpop.xlane.xlu0 %1635  ;;  %v4305_v52 = vsel %vm2178_vm8, %v2360_v34, %v2381_v61  ;;  %v2697_v61 = vunpack.c.l.bf16 %v4331_v12  ;;  %v3061_v12 = vld [vmem:[#allocation14 + $0x148] sm:$0xff]  }
 0x8e7   :  { %v2296_v60 = vrot.slane %v1971_v30, %v4222_v53  ;;  %v1700_v35 = vadd.f32 %v4215_v45, %v1636_v44 }
 0x8e8   :  { %v1638_v2 = vpop.xlane.xlu1 %1637  ;;  %vm4384_vm11 = vcmp.gt.f32.partialorder %v2697_v61, 0.0 }
 0x8e9   :  { %v1701_v15 = vadd.f32 %v4215_v45, %v1638_v2  ;;  %v2297_v4 = vsel %vm2233_vm1, %v2296_v60, %v2292_v6  ;;  %v2025_v36 = vrot.slane %v1700_v35, %v4327_v18 }
 0x8ea   :  { %v1640_v23 = vpop.xlane.xlu0 %1639  ;;  %v4351_v16 = vsel %vm2180_vm9, %v2297_v4, %v2375_v25 }
 0x8eb   :  { %v1702_v22 = vadd.f32 %v4215_v45, %v1640_v23  ;;  %v2030_v27 = vrot.slane %v1701_v15, %v4320_v19 }
 0x8ec   :  { %v1642_v41 = vpop.xlane.xlu1 %1641 }
 0x8ed   :  { %v1703_v5 = vadd.f32 %v4215_v45, %v1642_v41  ;;  %v2036_v59 = vrot.slane %v1702_v22, %v4327_v18  ;;  %v2032_v49 = vsel %vm2031_vm10, %v2030_v27, %v2025_v36 }
 0x8ee   :  { %v1668_v7 = vpop.xlane.xlu0 %1667 }
 0x8ef   :  { %v2040_v28 = vrot.slane %v1703_v5, %v4320_v19  ;;  %v1716_v26 = vadd.f32 %v4215_v45, %v1668_v7 }
 0x8f0   :  { %v1670_v58 = vpop.xlane.xlu1 %1669 }
 0x8f1   :  { %v1717_v21 = vadd.f32 %v4215_v45, %v1670_v58  ;;  %v2041_v23 = vsel %vm2031_vm10, %v2040_v28, %v2036_v59  ;;  %v2099_v25 = vrot.slane %v1716_v26, %v4327_v18 }
 0x8f2   :  { %v1672_v47 = vpop.xlane.xlu0 %1671 }
 0x8f3   :  { %v1718_v8 = vadd.f32 %v4215_v45, %v1672_v47  ;;  %v2103_v34 = vrot.slane %v1717_v21, %v4320_v19 }
 0x8f4   :  { %v1674_v3 = vpop.xlane.xlu1 %1673 }
 0x8f5   :  { %v1719_v37 = vadd.f32 %v4215_v45, %v1674_v3  ;;  %v2108_v44 = vrot.slane %v1718_v8, %v4327_v18  ;;  %v2104_v10 = vsel %vm2031_vm10, %v2103_v34, %v2099_v25 }
 0x8f6   :  { %v1644_v55 = vpop.xlane.xlu0 %1643 }
 0x8f7   :  { %v2112_v62 = vrot.slane %v1719_v37, %v4320_v19  ;;  %v1704_v43 = vadd.f32 %v4215_v45, %v1644_v55 }
 0x8f8   :  { %v1646_v17 = vpop.xlane.xlu1 %1645 }
 0x8f9   :  { %v1705_v9 = vadd.f32 %v4215_v45, %v1646_v17  ;;  %v2113_v3 = vsel %vm2031_vm10, %v2112_v62, %v2108_v44 }
 0x8fa   :  { %v1676_v11 = vpop.xlane.xlu0 %1675  ;;  %v2182_v35 = vsel %vm2168_vm2, %v2113_v3, %v2104_v10 }
 0x8fb   :  { %v2049_v41 = vrot.slane %v1705_v9, %v4320_v19  ;;  %v1720_v55 = vadd.f32 %v4215_v45, %v1676_v11 }
 0x8fc   :  { %v1678_v46 = vpop.xlane.xlu1 %1677 }
 0x8fd   :  { %v1721_v2 = vadd.f32 %v4215_v45, %v1678_v46  ;;  %v2117_v37 = vrot.slane %v1720_v55, %v4327_v18 }
 0x8fe   :  { %v1648_v42 = vpop.xlane.xlu0 %1647 }
 0x8ff   :  { %v1706_v7 = vadd.f32 %v4215_v45, %v1648_v42  ;;  %v2121_v60 = vrot.slane %v1721_v2, %v4320_v19 }
 0x900   :  { %v1650_v63 = vpop.xlane.xlu1 %1649 }
 0x901   :  { %v1707_v38 = vadd.f32 %v4215_v45, %v1650_v63  ;;  %v2045_v63 = vrot.slane %v1704_v43, %v4327_v18  ;;  %v2054_v5 = vrot.slane %v1706_v7, %v4327_v18  ;;  %v2122_v36 = vsel %vm2031_vm10, %v2121_v60, %v2117_v37 }
 0x902   :  { %v4307_v50 = vpop.xlane.xlu0 %1679  ;;  %v2183_v37 = vsel %vm2170_vm3, %v2122_v36, %v2182_v35 }
 0x903   :  { %v2058_v46 = vrot.slane %v1707_v38, %v4320_v19  ;;  %v2050_v11 = vsel %vm2031_vm10, %v2049_v41, %v2045_v63  ;;  %v1722_v22 = vadd.f32 %v4215_v45, %v4307_v50 }
 0x904   :  { %v4309_v29 = vpop.xlane.xlu1 %1681 }
 0x905   :  { %v2059_v21 = vsel %vm2031_vm10, %v2058_v46, %v2054_v5  ;;  %v1723_v8 = vadd.f32 %v4215_v45, %v4309_v29  ;;  %v2126_v34 = vrot.slane %v1722_v22, %v4327_v18 }
 0x906   :  { %v1652_v48 = vpop.xlane.xlu0 %1651 }
 0x907   :  { %v1708_v30 = vadd.f32 %v4215_v45, %v1652_v48 }
 0x908   :  { %v1654_v54 = vpop.xlane.xlu1 %1653 }
 0x909   :  { %v1709_v58 = vadd.f32 %v4215_v45, %v1654_v54  ;;  %v2169_v54 = vsel %vm2168_vm2, %v2041_v23, %v2032_v49  ;;  %v2063_v4 = vrot.slane %v1708_v30, %v4327_v18  ;;  %v2130_v23 = vrot.slane %v1723_v8, %v4320_v19 }
 0x90a   :  { %v4311_v20 = vpop.xlane.xlu0 %1683  ;;  %v2171_v50 = vsel %vm2170_vm3, %v2050_v11, %v2169_v54 }
 0x90b   :  { %v2173_v49 = vsel %vm2172_vm4, %v2059_v21, %v2171_v50  ;;  %v1724_v41 = vadd.f32 %v4215_v45, %v4311_v20  ;;  %v2131_v10 = vsel %vm2031_vm10, %v2130_v23, %v2126_v34 }
 0x90c   :  { %v4315_v1 = vpop.xlane.xlu1 %1685 }
 0x90d   :  { %v1725_v43 = vadd.f32 %v4215_v45, %v4315_v1  ;;  %v2135_v60 = vrot.slane %v1724_v41, %v4327_v18 }
 0x90e   :  { %v1656_v13 = vpop.xlane.xlu0 %1655 }
 0x90f   :  { %v1710_v15 = vadd.f32 %v4215_v45, %v1656_v13  ;;  %v2139_v55 = vrot.slane %v1725_v43, %v4320_v19 }
 0x910   :  { %v1658_v31 = vpop.xlane.xlu1 %1657 }
 0x911   :  { %v1711_v17 = vadd.f32 %v4215_v45, %v1658_v31  ;;  %v2067_v31 = vrot.slane %v1709_v58, %v4320_v19  ;;  %v2072_v26 = vrot.slane %v1710_v15, %v4327_v18  ;;  %v2140_v22 = vsel %vm2031_vm10, %v2139_v55, %v2135_v60  ;;  %v3066_v60 = vld [vmem:[#allocation14 + $0x170] sm:$0xff]  }
 0x912   :  { %v4334_v14 = vpop.xlane.xlu0 %1687 }
 0x913   :  { %v2076_v27 = vrot.slane %v1711_v17, %v4320_v19  ;;  %v2068_v59 = vsel %vm2031_vm10, %v2067_v31, %v2063_v4 }
 0x914   :  { %v1690_v39 = vpop.xlane.xlu1 %1689  ;;  %v2175_v58 = vsel %vm2174_vm5, %v2068_v59, %v2173_v49 }
 0x915   :  { %v1727_v29 = vadd.f32 %v4215_v45, %v1690_v39  ;;  %v2077_v44 = vsel %vm2031_vm10, %v2076_v27, %v2072_v26 }
 0x916   :  { %v1660_v33 = vpop.xlane.xlu0 %1659  ;;  %v2177_v46 = vsel %vm2176_vm7, %v2077_v44, %v2175_v58 }
 0x917   :  { %v1712_v6 = vadd.f32 %v4215_v45, %v1660_v33  ;;  %v2148_v17 = vrot.slane %v1727_v29, %v4320_v19 }
 0x918   :  { %v1662_v47 = vpop.xlane.xlu1 %1661 }
 0x919   :  { %v1713_v51 = vadd.f32 %v4215_v45, %v1662_v47  ;;  %v2081_v38 = vrot.slane %v1712_v6, %v4327_v18  ;;  %v1726_v47 = vadd.f32 %v4215_v45, %v4334_v14 }
 0x91a   :  { %v1692_v42 = vpop.xlane.xlu0 %1691 }
 0x91b   :  { %v2085_v28 = vrot.slane %v1713_v51, %v4320_v19  ;;  %v1728_v20 = vadd.f32 %v4215_v45, %v1692_v42  ;;  %v2144_v5 = vrot.slane %v1726_v47, %v4327_v18 }
 0x91c   :  { %v1694_v48 = vpop.xlane.xlu1 %1693 }
 0x91d   :  { %v2086_v1 = vsel %vm2031_vm10, %v2085_v28, %v2081_v38  ;;  %v1729_v39 = vadd.f32 %v4215_v45, %v1694_v48  ;;  %v2153_v27 = vrot.slane %v1728_v20, %v4327_v18  ;;  %v2149_v4 = vsel %vm2031_vm10, %v2148_v17, %v2144_v5 }
 0x91e   :  { %v1664_v9 = vpop.xlane.xlu0 %1663  ;;  %v2179_v14 = vsel %vm2178_vm8, %v2086_v1, %v2177_v46 }
 0x91f   :  { %v1714_v62 = vadd.f32 %v4215_v45, %v1664_v9  ;;  %v2157_v15 = vrot.slane %v1729_v39, %v4320_v19 }
 0x920   :  { %v1666_v33 = vpop.xlane.xlu1 %1665 }
 0x921   :  { %v1715_v2 = vadd.f32 %v4215_v45, %v1666_v33  ;;  %v2090_v25 = vrot.slane %v1714_v62, %v4327_v18  ;;  %v2158_v35 = vsel %vm2031_vm10, %v2157_v15, %v2153_v27  ;;  %v3067_v15 = vld [vmem:[#allocation14 + $0x178] sm:$0xff]  }
 0x922   :  { %v1696_v7 = vpop.xlane.xlu0 %1695 }
 0x923   :  { %v2094_v3 = vrot.slane %v1715_v2, %v4320_v19  ;;  %v1730_v30 = vadd.f32 %v4215_v45, %v1696_v7 }
 0x924   :  { %v1698_v63 = vpop.xlane.xlu1 %1697 }
 0x925   :  { %v1731_v51 = vadd.f32 %v4215_v45, %v1698_v63  ;;  %v2095_v54 = vsel %vm2031_vm10, %v2094_v3, %v2090_v25  ;;  %v2162_v28 = vrot.slane %v1730_v30, %v4327_v18  ;;  %v3060_v30 = vld [vmem:[#allocation14 + $0x140] sm:$0xff]  }
 0x926   :  { %v1953_v11 = vpop.xlane.xlu0 %1952  ;;  %v2181_v42 = vsel %vm2180_vm9, %v2095_v54, %v2179_v14  ;;  %v3063_v54 = vld [vmem:[#allocation14 + $0x158] sm:$0xff]   ;;  %v3064_v14 = vld [vmem:[#allocation14 + $0x160] sm:$0xff]  }
 0x927   :  { %v2166_v31 = vrot.slane %v1731_v51, %v4320_v19  ;;  %v1986_v6 = vadd.f32 %v1953_v11, %v4215_v45  ;;  %v2386_v48 = vsel %vm523_vm6, %v2181_v42, %v4351_v16  ;;  %v2184_v16 = vsel %vm2172_vm4, %v2131_v10, %v2183_v37  ;;  %v3065_v10 = vld [vmem:[#allocation14 + $0x168] sm:$0xff]  }
 0x928   :  { %v1955_v21 = vpop.xlane.xlu1 %1954  ;;  %v2394_v8 = vsel %vm4384_vm11, %v2386_v48, -1e+30  ;;  %v2185_v50 = vsel %vm2174_vm5, %v2140_v22, %v2184_v16 }
 0x929   :  { %v1987_v19 = vadd.f32 %v1955_v21, %v4215_v45  ;;  %v2397_v9 = vsel %vm2396_vm12, %v2394_v8, -inf  ;;  %v2364_v36 = vrot.slane %v1986_v6, %v4218_v40  ;;  %v2167_v62 = vsel %vm2031_vm10, %v2166_v31, %v2162_v28 }
 0x92a   :  { %2398 = vmax.xlane.f32.xlu0 %v2397_v9  ;;  %v2186_v59 = vsel %vm2176_vm7, %v2149_v4, %v2185_v50 }
 0x92b   :  { %v2368_v26 = vrot.slane %v1987_v19, %v4222_v53  ;;  %v2187_v18 = vsel %vm2178_vm8, %v2158_v35, %v2186_v59 }
 0x92c   :  { %v2188_v43 = vsel %vm2180_vm9, %v2167_v62, %v2187_v18 }
 0x92d   :  { %v2369_v45 = vsel %vm2233_vm1, %v2368_v26, %v2364_v36 }
 0x92e   :  { %v2383_v29 = vsel %vm2180_vm9, %v2369_v45, %v4305_v52 }
 0x92f   :  { %v2387_v40 = vsel %vm523_vm6, %v2188_v43, %v2383_v29 }
 0x930   :  { %v2395_v38 = vsel %vm2393_vm13, %v2387_v40, -1e+30 }
 0x931   :  { %v2400_v53 = vsel %vm2396_vm12, %v2395_v38, -inf }
 0x932   :  { %2401 = vmax.xlane.f32.xlu1 %v2400_v53 }
 0x9b7   :  { %v2399_v33 = vpop.xlane.xlu0 %2398 }
 0x9b8   :  { %v2403_v49 = vsub.f32 %v2386_v48, %v2399_v33 }
 0x9ba   :  { %v2405_v34 = vsel %vm4384_vm11, %v2403_v49, -1e+30 }
 0x9bb   :  { %v2407_v44 = vmul.f32 1.442695, %v2405_v34 }
 0x9bd   :  { %3076 = vpow2.f32 %v2407_v44 }
 0x9bf   :  { %v2402_v2 = vpop.xlane.xlu1 %2401 }
 0x9c0   :  { %v2404_v23 = vsub.f32 %v2387_v40, %v2402_v2 }
 0x9c2   :  { %v2406_v41 = vsel %vm2393_vm13, %v2404_v23, -1e+30 }
 0x9c3   :  { %v2409_v1 = vmul.f32 1.442695, %v2406_v41 }
 0x9c5   :  { %3078 = vpow2.f32 %v2409_v1 }
 0x9c7   :  { %v3077_v39 = vpop.eup %3076 }
 0x9c8   :  { %v2411_v52 = vmul.f32 %v3077_v39, %v2697_v61 }
 0x9ca   :  { %v2413_v7 = vsel %vm2396_vm12, %v2411_v52, 0.0 }
 0x9cb   :  { %2414 = vadd.xlane.f32.xlu0 %v2413_v7 }
 0x9cf   :  { %v3079_v58 = vpop.eup %3078 }
 0x9d0   :  { %v2412_v47 = vmul.f32 %v3079_v58, %v2698_v32  ;;  %v3062_v32 = vld [vmem:[#allocation14 + $0x150] sm:$0xff]  }
 0x9d2   :  { %v2416_v13 = vsel %vm2396_vm12, %v2412_v47, 0.0 }
 0x9d3   :  { %2417 = vadd.xlane.f32.xlu1 %v2416_v13 }
 0xa58   :  { %v2415_v25 = vpop.xlane.xlu0 %2414 }
 0xa59   :  { %v2419_v3 = vadd.f32 1e-06, %v2415_v25 }
 0xa5b   :  { %3080 = vrcp.f32 %v2419_v3 }
 0xa60   :  { %v2418_v55 = vpop.xlane.xlu1 %2417 }
 0xa61   :  { %v2420_v17 = vadd.f32 1e-06, %v2418_v55 }
 0xa63   :  { %3082 = vrcp.f32 %v2420_v17 }
 0xa65   :  { %v3081_v20 = vpop.eup %3080 }
 0xa66   :  { %v2423_v46 = vmul.f32 %v3081_v20, %v2411_v52 }
 0xa6d   :  { %v3083_v63 = vpop.eup %3082 }
 0xa6e   :  { %v2424_v61 = vmul.f32 %v3083_v63, %v2412_v47 }
 0xa70   :  { %v2425_v51 = vpack.c.bf16 %v2424_v61, %v2423_v46 }
 0xa72   :  { %2951 = vmatmul.mubr.msk.bf16.vlgmr.msra.gmra.mrb[24].mxu1 %vm2396_vm12, %v2425_v51 }
 0xa73   :  { %2955 = vmatpush3.bf16.msra.mxu1 %v3060_v30  ;;  %2970 = vmatprep.mubr.msk.bf16.mxu1 %vm3355_vm0, %v3354_v0 }
 0xa74   :  { %2956 = vmatprep.subr.bf16.mxu1 %v3354_v0 }
 0xa77   :  { %2957 = vmatpush3.bf16.msra.mxu1 %v3061_v12 }
 0xa78   :  { %2958 = vmatprep.subr.bf16.mxu1 %v3354_v0 }
 0xa7b   :  { %2959 = vmatpush3.bf16.msra.mxu1 %v3062_v32 }
 0xa7c   :  { %2960 = vmatprep.subr.bf16.mxu1 %v3354_v0 }
 0xa7f   :  { %2961 = vmatpush3.bf16.msra.mxu1 %v3063_v54 }
 0xa80   :  { %2962 = vmatprep.subr.bf16.mxu1 %v3354_v0 }
 0xa83   :  { %2963 = vmatpush3.bf16.msra.mxu1 %v3064_v14 }
 0xa84   :  { %2964 = vmatprep.subr.bf16.mxu1 %v3354_v0 }
 0xa87   :  { %2965 = vmatpush3.bf16.msra.mxu1 %v3065_v10 }
 0xa88   :  { %2966 = vmatprep.subr.bf16.mxu1 %v3354_v0 }
 0xa8b   :  { %2967 = vmatpush3.bf16.msra.mxu1 %v3066_v60 }
 0xa8c   :  { %2968 = vmatprep.subr.bf16.mxu1 %v3354_v0 }
 0xa8f   :  { %2969 = vmatpush3.bf16.msra.mxu1 %v3067_v15 }
 0xb45   :  { %v2463_v11 = vpop.f32.mrb[24].mxu1 }
 0xb46   :  { %v2952_v42 = vpop.f32.mrb[25].mxu1 }
 0xb47   :  { %v2466_v5 = vpop.f32.mrb[26].mxu1 }
 0xb48   :  { %v2470_v31 = vpack.c.bf16 %v2466_v5, %v2463_v11  ;;  %v2953_v6 = vpop.f32.mrb[27].mxu1 }
 0xb4a   :  { %2971 = vmatmul.mubr.bf16.vlgmr.msra.gmra.mrb[28].mxu1 %v2470_v31 }
 0xb4b   :  { %3294 = shalt.err (!%p3291_p6)
}
 0xb4c   :  { %s3295_s16 = scalar_lea.hbm %s4520_s11, 512 }
 0xb4d   :  { %p3296_p7 = scmp.ne.s32.totalorder %s4520_s11, %s3295_s16  ;;  %p3299_p8 = scmp.lt.u32.totalorder %s3295_s16, %s4520_s11 }
 0xb4f   :  { %p3301_p9 = pnand %p3299_p8, %p3296_p7 }
 0xb51   :  { %3304 = shalt.err (!%p3301_p9)
}
 0xb52   :  { %2595 = dma.vmem_to_hbm [thread:$0]  %s2590_s24, 512, %s4520_s11, [#allocation20], %s3343_s29, %s3343_s29, %s3344_s30   ;;  %v2473_v0 = vsub.s32 5, %v3609_v24  ;;  %v3084_v48 = vld [vmem:[#allocation17] sm:$0x7f] }
 0xb53   :  { %s3358_s22 = smov [#allocation18]  }
 0xb54   :  { %v2474_v37 = vrot.slane %v3084_v48, %v2473_v0  ;;  %s2577_s23 = sshll.u32 %s3358_s22, 4  ;;  %s2578_s23 = int_to_ptr.vmem [resolvable:$true] %s2577_s23 }
 0xb55   :  { %s3305_s11 = scalar_lea.vmem %s2578_s23, 256  ;;  %p3310_p11 = scmp.lt.s32.totalorder %s2578_s23, %s2578_s23 }
 0xb56   :  { %p3306_p10 = scmp.ne.s32.totalorder %s2578_s23, %s3305_s11  ;;  %p3311_p12 = scmp.lt.s32.totalorder %s3305_s11, %s3305_s11 }
 0xb58   :  { %p3312_p13 = por %p3311_p12, %p3310_p11 }
 0xb5a   :  { %p3313_p0 = pnand %p3312_p13, %p3306_p10 }
 0xc1d   :  { %v2557_v22 = vpop.f32.mrb[28].mxu1 }
 0xc1e   :  { %v2558_v27 = vadd.f32 %v2557_v22, %v2474_v37  ;;  %v2972_v21 = vpop.f32.mrb[29].mxu1 }
 0xc1f   :  { %v2560_v8 = vpop.f32.mrb[30].mxu1 }
 0xc20   :  { %v2564_v4 = vadd.f32 %v2558_v27, %v3650_v56  ;;  %v2561_v28 = vadd.f32 %v2560_v8, %v2474_v37  ;;  %v2973_v19 = vpop.f32.mrb[31].mxu1 }
 0xc22   :  { %2566 = vst [vmem:[#allocation18] sm:$0xff] %v2564_v4  ;;  %v2565_v9 = vadd.f32 %v2561_v28, %v3653_v57 }
 0xc24   :  { %2567 = vst [vmem:[#allocation18 + $0x8] sm:$0xff] %v2565_v9 }
 0xc25   :  { %3316 = shalt.err (!%p3313_p0)
}
 0xc26   :  { %s3317_s7 = scalar_lea.hbm %s4519_s10, 256 }
 0xc27   :  { %p3318_p1 = scmp.ne.s32.totalorder %s4519_s10, %s3317_s7  ;;  %p3321_p2 = scmp.lt.u32.totalorder %s3317_s7, %s4519_s10 }
 0xc29   :  { %p3323_p3 = pnand %p3321_p2, %p3318_p1 }
 0xc2b   :  { %3326 = shalt.err (!%p3323_p3)
}
 0xc2c   :  { %2583 = dma.vmem_to_hbm [thread:$0]  %s2578_s23, 256, %s4519_s10, [#allocation5], %s3343_s29, %s3343_s29, %s3344_s30  }
 0xc2d   :  { %3337 = dma.done.wait [#allocation5], 256  }
 0xc2e   :  { %3338 = vsyncadd [#allocation5], 4294967040 }
 0xc2f   :  { %3339 = dma.done.wait [#allocation20], 512  }
 0xc30   :  { %3340 = vsyncadd [#allocation20], 4294966784 }
 0xc31   :  { %2602 = vsyncpa [#allocation4], 1 }
 0xc32   :  { %2603 = vsyncpa [#allocation7], 1 }
 0xc33   :  { %2604 = vsyncpa [#allocation10], 1 }
 0xc34   :  { %2605 = vsyncpa [#allocation13], 1 }
 0xc35   :  { %2606 = vsyncpa [#allocation16], 1 }
 0xc36   :  { %2607 = vsyncpa [#allocation5], 1 }
 0xc37   :  { %2608 = vsyncpa [#allocation20], 1 }

</bundles_post_ra>
